<compile_context>
chip_gen: v6e
topology: v6e:2x2x1
jax: 0.10.0
libtpu: 0.0.40
codegen_flags: <defaults>
</compile_context>

<pallas_src>
import functools

import jax
import jax.numpy as jnp
from jax.experimental import pallas as pl
from jax.experimental.pallas import tpu as pltpu


# ------------------------------ Pallas kernel -------------------------------

def _sq_rel_mhsa_kernel(lens_ref, x_ref, pe_ref, gamma_ref, beta_ref,
                        wqkv_ref, bqkv_ref, o_ref, *, B, M, h, masking_value):
    """Whole (small) problem in one grid step; everything VMEM/vreg resident.

    lens_ref   : [B]       int32, SMEM (scalar-prefetched) valid lengths
    x_ref      : [B*M, d]  input activations (batch folded into rows)
    pe_ref     : [B*M, d]  sinusoidal positional encoding, pre-tiled over batch
    gamma/beta : [1, d]    Scaling1d parameters
    wqkv_ref   : [d, 3d]   fused Q|K|V projection weights, bf16, [in, out] layout
    bqkv_ref   : [1, 3d]   fused Q|K|V bias (f32)
    o_ref      : [B*M, d]
    """
    d = x_ref.shape[-1]
    dk = d // h

    # Scaling1d + positional-encoding add, fused on the VPU (f32).
    s = gamma_ref[...] * x_ref[...] + beta_ref[...] + pe_ref[...]          # [B*M, d]

    # Fused QKV projection: a single MXU push over all B*M rows.
    # bf16 operands, f32 accumulation.
    qkv = (jnp.dot(s.astype(jnp.bfloat16), wqkv_ref[...],
                   preferred_element_type=jnp.float32)
           + bqkv_ref[...])                                                # [B*M, 3d]

    # NOTE: the reference divides logits by d_model (not sqrt(dk)) and applies
    # the masking_value fill BEFORE that division — replicated exactly.
    inv_d = 1.0 / float(d)

    qpos = jax.lax.broadcasted_iota(jnp.int32, (M, M), 0)   # query index
    kpos = jax.lax.broadcasted_iota(jnp.int32, (M, M), 1)   # key index

    for b in range(B):                                       # B small & static
        L = lens_ref[b]
        # One additive mask bias per batch element, shared by every head.
        # (adding -1e15 in f32 is numerically identical to masked_fill here)
        bias = jnp.where((qpos < L) & (kpos < L), 0.0, masking_value)      # [M, M]

        q_b = qkv[b * M:(b + 1) * M, 0 * d:1 * d]
        k_b = qkv[b * M:(b + 1) * M, 1 * d:2 * d]
        v_b = qkv[b * M:(b + 1) * M, 2 * d:3 * d]

        outs = []
        # TODO(synk): at M=16 the [M, M] score tiles only fill 16/128 lanes; a
        # production M >= 128 fills the lane axis and needs no change.
        for hi in range(h):                                  # h small & static
            q_h = q_b[:, hi * dk:(hi + 1) * dk].astype(jnp.bfloat16)
            k_h = k_b[:, hi * dk:(hi + 1) * dk].astype(jnp.bfloat16)
            v_h = v_b[:, hi * dk:(hi + 1) * dk].astype(jnp.bfloat16)
            # q @ k^T without materializing a transpose (contract on dk axis).
            att = jax.lax.dot_general(q_h, k_h, (((1,), (1,)), ((), ())),
                                      preferred_element_type=jnp.float32)  # [M, M]
            att = (att + bias) * inv_d
            # numerically-stable softmax over keys (f32; recip on the EUP)
            att = att - jnp.max(att, axis=-1, keepdims=True)
            p = jnp.exp(att)
            denom = jnp.sum(p, axis=-1, keepdims=True)
            w = p * pl.reciprocal(denom, approx=True)
            outs.append(jnp.dot(w.astype(jnp.bfloat16), v_h,
                                preferred_element_type=jnp.float32))
        # Lane-dense [M, d] store (last dim d is a multiple of 128).
        o_ref[b * M:(b + 1) * M, :] = (
            jnp.concatenate(outs, axis=-1).astype(o_ref.dtype))


# -------------------------------- wrappers ----------------------------------

def sinusoidal_pos_enc(max_len, d_model):
    """speeq's get_positional_encoding: pe[:,0::2]=sin(t/10000^(2i/d)), pe[:,1::2]=cos."""
    pos = jnp.arange(max_len, dtype=jnp.float32)[:, None]
    i = jnp.arange(d_model // 2, dtype=jnp.float32)[None, :]
    angles = pos / jnp.power(10000.0, 2.0 * i / d_model)
    pe = jnp.stack([jnp.sin(angles), jnp.cos(angles)], axis=-1)
    return pe.reshape(max_len, d_model)


def squeezeformer_relative_mhsa(x, lengths, params, *, h, masking_value=-1e15):
    """x: [B, M, d] float32; lengths: [B] int32 valid prefix lengths (or None)."""
    B, M, d = x.shape
    assert d % h == 0

    pe = sinusoidal_pos_enc(M, d)                                    # [M, d]
    pe_tiled = jnp.broadcast_to(pe[None], (B, M, d)).reshape(B * M, d)
    x2d = x.reshape(B * M, d)                                        # fold batch into rows

    gamma = params["gamma"].reshape(1, d).astype(jnp.float32)
    beta = params["beta"].reshape(1, d).astype(jnp.float32)
    wqkv = params["wqkv"].astype(jnp.bfloat16)                       # [d, 3d], halves DMA
    bqkv = params["bqkv"].reshape(1, 3 * d).astype(jnp.float32)

    if lengths is None:
        lengths = jnp.full((B,), M, dtype=jnp.int32)
    lengths = lengths.astype(jnp.int32)

    kernel = functools.partial(_sq_rel_mhsa_kernel, B=B, M=M, h=h,
                               masking_value=float(masking_value))

    out2d = pl.pallas_call(
        kernel,
        out_shape=jax.ShapeDtypeStruct((B * M, d), jnp.float32),
        grid_spec=pltpu.PrefetchScalarGridSpec(
            num_scalar_prefetch=1,            # lengths -> SMEM
            grid=(1,),                        # single fused step (no per-batch loop)
            in_specs=[
                pl.BlockSpec((B * M, d), lambda i, lens: (0, 0)),      # x (rows = B*M)
                pl.BlockSpec((B * M, d), lambda i, lens: (0, 0)),      # pos enc (tiled)
                pl.BlockSpec((1, d), lambda i, lens: (0, 0)),          # gamma
                pl.BlockSpec((1, d), lambda i, lens: (0, 0)),          # beta
                pl.BlockSpec((d, 3 * d), lambda i, lens: (0, 0)),      # fused QKV weights
                pl.BlockSpec((1, 3 * d), lambda i, lens: (0, 0)),      # fused QKV bias
            ],
            out_specs=pl.BlockSpec((B * M, d), lambda i, lens: (0, 0)),
        ),
        compiler_params=pltpu.CompilerParams(
            dimension_semantics=("arbitrary",)),
    )(lengths, x2d, pe_tiled, gamma, beta, wqkv, bqkv)

    return out2d.reshape(B, M, d)


def reference_forward(x, lengths, params, *, h, masking_value=-1e15):
    """Pure-JAX f32 reference mirroring the PyTorch module (eval mode)."""
    B, M, d = x.shape
    dk = d // h
    pe = sinusoidal_pos_enc(M, d)
    s = params["gamma"].reshape(1, 1, d) * x + params["beta"].reshape(1, 1, d) + pe[None]
    qkv = jnp.einsum("bmd,de->bme", s, params["wqkv"]) + params["bqkv"]
    q, k, v = qkv[..., :d], qkv[..., d:2 * d], qkv[..., 2 * d:]
    q = q.reshape(B, M, h, dk).transpose(0, 2, 1, 3)
    k = k.reshape(B, M, h, dk).transpose(0, 2, 1, 3)
    v = v.reshape(B, M, h, dk).transpose(0, 2, 1, 3)
    att = jnp.einsum("bhqe,bhke->bhqk", q, k)
    pos = jnp.arange(M)
    valid = ((pos[None, :, None] < lengths[:, None, None]) &
             (pos[None, None, :] < lengths[:, None, None]))            # [B, Mq, Mk]
    att = jnp.where(valid[:, None], att, masking_value)
    att = jax.nn.softmax(att / d, axis=-1)
    out = jnp.einsum("bhqk,bhke->bhqe", att, v)
    return out.transpose(0, 2, 1, 3).reshape(B, M, d)


def init_params(key, d_model):
    kq, kk, kv, kb, kg, kbe = jax.random.split(key, 6)
    wq = jax.random.normal(kq, (d_model, d_model), jnp.float32) * 0.05
    wk = jax.random.normal(kk, (d_model, d_model), jnp.float32) * 0.05
    wv = jax.random.normal(kv, (d_model, d_model), jnp.float32) * 0.05
    bqkv = jax.random.normal(kb, (3 * d_model,), jnp.float32) * 0.01
    return {
        "wqkv": jnp.concatenate([wq, wk, wv], axis=1),   # [d, 3d], [in, out] layout
        "bqkv": bqkv,
        "gamma": jax.random.normal(kg, (d_model,), jnp.float32),
        "beta": jax.random.normal(kbe, (d_model,), jnp.float32),
    }


# ----------------------------------- main ------------------------------------

if __name__ == "__main__":
    d_model, h, B, M = 128, 4, 2, 16

    key = jax.random.PRNGKey(0)
    key, kx, kp = jax.random.split(key, 3)
    x = jax.random.normal(kx, (B, M, d_model), jnp.float32)
    lengths = jnp.array([16, 12], dtype=jnp.int32)     # per-batch valid prefix lengths
    params = init_params(kp, d_model)

    out = squeezeformer_relative_mhsa(x, lengths, params, h=h)
    out = jax.block_until_ready(out)

    assert out.shape == (B, M, d_model), out.shape
    assert bool(jnp.all(jnp.isfinite(out)))

    # Validate against a pure-JAX f32 reference (loose tol: bf16 MXU operands).
    ref = reference_forward(x, lengths, params, h=h)
    err = float(jnp.max(jnp.abs(out - ref)))
    assert err < 0.25, err

    print("KERNEL_OK")
</pallas_src>

<mosaic_0001>
module attributes {stable_mosaic.version = 11 : i64} {
  func.func @_sq_rel_mhsa_kernel(%arg0: i32, %arg1: memref<2xi32, #tpu.memory_space<smem>>, %arg2: memref<32x128xf32, #tpu.memory_space<vmem>>, %arg3: memref<32x128xf32, #tpu.memory_space<vmem>>, %arg4: memref<1x128xf32, #tpu.memory_space<vmem>>, %arg5: memref<1x128xf32, #tpu.memory_space<vmem>>, %arg6: memref<128x384xbf16, #tpu.memory_space<vmem>>, %arg7: memref<1x384xf32, #tpu.memory_space<vmem>>, %arg8: memref<32x128xf32, #tpu.memory_space<vmem>>) attributes {dimension_semantics = [#tpu.dimension_semantics<arbitrary>], iteration_bounds = array<i64: 1>, scalar_prefetch = 1 : i64, scratch_operands = 0 : i64, tpu.core_type = #tpu.core_type<tc>, window_params = [{pipeline_mode = #tpu.pipeline_mode<synchronous>, transform_indices = @transform_0, window_bounds = array<i64: 32, 128>}, {pipeline_mode = #tpu.pipeline_mode<synchronous>, transform_indices = @transform_1, window_bounds = array<i64: 32, 128>}, {pipeline_mode = #tpu.pipeline_mode<synchronous>, transform_indices = @transform_2, window_bounds = array<i64: 1, 128>}, {pipeline_mode = #tpu.pipeline_mode<synchronous>, transform_indices = @transform_3, window_bounds = array<i64: 1, 128>}, {pipeline_mode = #tpu.pipeline_mode<synchronous>, transform_indices = @transform_4, window_bounds = array<i64: 128, 384>}, {pipeline_mode = #tpu.pipeline_mode<synchronous>, transform_indices = @transform_5, window_bounds = array<i64: 1, 384>}, {pipeline_mode = #tpu.pipeline_mode<synchronous>, transform_indices = @transform_6, window_bounds = array<i64: 32, 128>}]} {
    %c0 = arith.constant 0 : index
    %c0_0 = arith.constant 0 : index
    %0 = vector.load %arg4[%c0, %c0_0] : memref<1x128xf32, #tpu.memory_space<vmem>>, vector<1x128xf32>
    %c0_1 = arith.constant 0 : index
    %c0_2 = arith.constant 0 : index
    %1 = vector.load %arg2[%c0_1, %c0_2] : memref<32x128xf32, #tpu.memory_space<vmem>>, vector<32x128xf32>
    %2 = vector.broadcast %0 : vector<1x128xf32> to vector<32x128xf32>
    %3 = arith.mulf %2, %1 : vector<32x128xf32>
    %c0_3 = arith.constant 0 : index
    %c0_4 = arith.constant 0 : index
    %4 = vector.load %arg5[%c0_3, %c0_4] : memref<1x128xf32, #tpu.memory_space<vmem>>, vector<1x128xf32>
    %5 = vector.broadcast %4 : vector<1x128xf32> to vector<32x128xf32>
    %6 = arith.addf %3, %5 : vector<32x128xf32>
    %c0_5 = arith.constant 0 : index
    %c0_6 = arith.constant 0 : index
    %7 = vector.load %arg3[%c0_5, %c0_6] : memref<32x128xf32, #tpu.memory_space<vmem>>, vector<32x128xf32>
    %8 = arith.addf %6, %7 : vector<32x128xf32>
    %9 = arith.truncf %8 : vector<32x128xf32> to vector<32x128xbf16>
    %c0_7 = arith.constant 0 : index
    %c0_8 = arith.constant 0 : index
    %10 = vector.load %arg6[%c0_7, %c0_8] : memref<128x384xbf16, #tpu.memory_space<vmem>>, vector<128x384xbf16>
    %cst = arith.constant dense<0.000000e+00> : vector<32x384xf32>
    %11 = tpu.matmul %9, %10, %cst {dimension_numbers = #tpu.dot_dimension_numbers<[1], [0], [0], [1], [0, 0, 1, 1], [], []>} : vector<32x128xbf16>, vector<128x384xbf16>, vector<32x384xf32> -> vector<32x384xf32>
    %c0_9 = arith.constant 0 : index
    %c0_10 = arith.constant 0 : index
    %12 = vector.load %arg7[%c0_9, %c0_10] : memref<1x384xf32, #tpu.memory_space<vmem>>, vector<1x384xf32>
    %13 = vector.broadcast %12 : vector<1x384xf32> to vector<32x384xf32>
    %14 = arith.addf %11, %13 : vector<32x384xf32>
    %15 = tpu.iota {dimensions = array<i32: 0>} : vector<16x16xi32>
    %16 = tpu.iota {dimensions = array<i32: 1>} : vector<16x16xi32>
    %c0_11 = arith.constant 0 : index
    %17 = memref.load %arg1[%c0_11] : memref<2xi32, #tpu.memory_space<smem>>
    %18 = vector.broadcast %17 : i32 to vector<16x16xi32>
    %19 = arith.cmpi slt, %15, %18 : vector<16x16xi32>
    %20 = vector.broadcast %17 : i32 to vector<16x16xi32>
    %21 = arith.cmpi slt, %16, %20 : vector<16x16xi32>
    %22 = arith.andi %19, %21 : vector<16x16xi1>
    %cst_12 = arith.constant 0.000000e+00 : f32
    %cst_13 = arith.constant -9.99999986E+14 : f32
    %23 = vector.broadcast %cst_12 : f32 to vector<16x16xf32>
    %24 = vector.broadcast %cst_13 : f32 to vector<16x16xf32>
    %25 = arith.select %22, %23, %24 : vector<16x16xi1>, vector<16x16xf32>
    %26 = vector.extract_strided_slice %14 {offsets = [0, 0], sizes = [16, 128], strides = [1, 1]} : vector<32x384xf32> to vector<16x128xf32>
    %27 = vector.extract_strided_slice %14 {offsets = [0, 128], sizes = [16, 128], strides = [1, 1]} : vector<32x384xf32> to vector<16x128xf32>
    %28 = vector.extract_strided_slice %14 {offsets = [0, 256], sizes = [16, 128], strides = [1, 1]} : vector<32x384xf32> to vector<16x128xf32>
    %29 = vector.extract_strided_slice %26 {offsets = [0, 0], sizes = [16, 32], strides = [1, 1]} : vector<16x128xf32> to vector<16x32xf32>
    %30 = arith.truncf %29 : vector<16x32xf32> to vector<16x32xbf16>
    %31 = vector.extract_strided_slice %27 {offsets = [0, 0], sizes = [16, 32], strides = [1, 1]} : vector<16x128xf32> to vector<16x32xf32>
    %32 = arith.truncf %31 : vector<16x32xf32> to vector<16x32xbf16>
    %33 = vector.extract_strided_slice %28 {offsets = [0, 0], sizes = [16, 32], strides = [1, 1]} : vector<16x128xf32> to vector<16x32xf32>
    %34 = arith.truncf %33 : vector<16x32xf32> to vector<16x32xbf16>
    %cst_14 = arith.constant dense<0.000000e+00> : vector<16x16xf32>
    %35 = tpu.matmul %30, %32, %cst_14 {dimension_numbers = #tpu.dot_dimension_numbers<[1], [1], [0], [0], [0, 0, 1, 0], [], []>} : vector<16x32xbf16>, vector<16x32xbf16>, vector<16x16xf32> -> vector<16x16xf32>
    %36 = arith.addf %35, %25 : vector<16x16xf32>
    %cst_15 = arith.constant 7.812500e-03 : f32
    %37 = vector.broadcast %cst_15 : f32 to vector<16x16xf32>
    %38 = arith.mulf %36, %37 : vector<16x16xf32>
    %cst_16 = arith.constant dense<0xFF800000> : vector<16xf32>
    %39 = vector.multi_reduction <maximumf>, %38, %cst_16 [1] : vector<16x16xf32> to vector<16xf32>
    %40 = vector.shape_cast %39 : vector<16xf32> to vector<16x1xf32>
    %41 = vector.broadcast %40 : vector<16x1xf32> to vector<16x16xf32>
    %42 = arith.subf %38, %41 : vector<16x16xf32>
    %43 = math.exp %42 : vector<16x16xf32>
    %cst_17 = arith.constant dense<0.000000e+00> : vector<16xf32>
    %44 = vector.multi_reduction <add>, %43, %cst_17 [1] : vector<16x16xf32> to vector<16xf32>
    %45 = vector.shape_cast %44 : vector<16xf32> to vector<16x1xf32>
    %46 = tpu.reciprocal %45 {approx = true} : vector<16x1xf32> -> vector<16x1xf32>
    %47 = vector.broadcast %46 : vector<16x1xf32> to vector<16x16xf32>
    %48 = arith.mulf %43, %47 : vector<16x16xf32>
    %49 = arith.truncf %48 : vector<16x16xf32> to vector<16x16xbf16>
    %cst_18 = arith.constant dense<0.000000e+00> : vector<16x32xf32>
    %50 = tpu.matmul %49, %34, %cst_18 {dimension_numbers = #tpu.dot_dimension_numbers<[1], [0], [0], [1], [0, 0, 1, 1], [], []>} : vector<16x16xbf16>, vector<16x32xbf16>, vector<16x32xf32> -> vector<16x32xf32>
    %51 = vector.extract_strided_slice %26 {offsets = [0, 32], sizes = [16, 32], strides = [1, 1]} : vector<16x128xf32> to vector<16x32xf32>
    %52 = arith.truncf %51 : vector<16x32xf32> to vector<16x32xbf16>
    %53 = vector.extract_strided_slice %27 {offsets = [0, 32], sizes = [16, 32], strides = [1, 1]} : vector<16x128xf32> to vector<16x32xf32>
    %54 = arith.truncf %53 : vector<16x32xf32> to vector<16x32xbf16>
    %55 = vector.extract_strided_slice %28 {offsets = [0, 32], sizes = [16, 32], strides = [1, 1]} : vector<16x128xf32> to vector<16x32xf32>
    %56 = arith.truncf %55 : vector<16x32xf32> to vector<16x32xbf16>
    %cst_19 = arith.constant dense<0.000000e+00> : vector<16x16xf32>
    %57 = tpu.matmul %52, %54, %cst_19 {dimension_numbers = #tpu.dot_dimension_numbers<[1], [1], [0], [0], [0, 0, 1, 0], [], []>} : vector<16x32xbf16>, vector<16x32xbf16>, vector<16x16xf32> -> vector<16x16xf32>
    %58 = arith.addf %57, %25 : vector<16x16xf32>
    %cst_20 = arith.constant 7.812500e-03 : f32
    %59 = vector.broadcast %cst_20 : f32 to vector<16x16xf32>
    %60 = arith.mulf %58, %59 : vector<16x16xf32>
    %cst_21 = arith.constant dense<0xFF800000> : vector<16xf32>
    %61 = vector.multi_reduction <maximumf>, %60, %cst_21 [1] : vector<16x16xf32> to vector<16xf32>
    %62 = vector.shape_cast %61 : vector<16xf32> to vector<16x1xf32>
    %63 = vector.broadcast %62 : vector<16x1xf32> to vector<16x16xf32>
    %64 = arith.subf %60, %63 : vector<16x16xf32>
    %65 = math.exp %64 : vector<16x16xf32>
    %cst_22 = arith.constant dense<0.000000e+00> : vector<16xf32>
    %66 = vector.multi_reduction <add>, %65, %cst_22 [1] : vector<16x16xf32> to vector<16xf32>
    %67 = vector.shape_cast %66 : vector<16xf32> to vector<16x1xf32>
    %68 = tpu.reciprocal %67 {approx = true} : vector<16x1xf32> -> vector<16x1xf32>
    %69 = vector.broadcast %68 : vector<16x1xf32> to vector<16x16xf32>
    %70 = arith.mulf %65, %69 : vector<16x16xf32>
    %71 = arith.truncf %70 : vector<16x16xf32> to vector<16x16xbf16>
    %cst_23 = arith.constant dense<0.000000e+00> : vector<16x32xf32>
    %72 = tpu.matmul %71, %56, %cst_23 {dimension_numbers = #tpu.dot_dimension_numbers<[1], [0], [0], [1], [0, 0, 1, 1], [], []>} : vector<16x16xbf16>, vector<16x32xbf16>, vector<16x32xf32> -> vector<16x32xf32>
    %73 = vector.extract_strided_slice %26 {offsets = [0, 64], sizes = [16, 32], strides = [1, 1]} : vector<16x128xf32> to vector<16x32xf32>
    %74 = arith.truncf %73 : vector<16x32xf32> to vector<16x32xbf16>
    %75 = vector.extract_strided_slice %27 {offsets = [0, 64], sizes = [16, 32], strides = [1, 1]} : vector<16x128xf32> to vector<16x32xf32>
    %76 = arith.truncf %75 : vector<16x32xf32> to vector<16x32xbf16>
    %77 = vector.extract_strided_slice %28 {offsets = [0, 64], sizes = [16, 32], strides = [1, 1]} : vector<16x128xf32> to vector<16x32xf32>
    %78 = arith.truncf %77 : vector<16x32xf32> to vector<16x32xbf16>
    %cst_24 = arith.constant dense<0.000000e+00> : vector<16x16xf32>
    %79 = tpu.matmul %74, %76, %cst_24 {dimension_numbers = #tpu.dot_dimension_numbers<[1], [1], [0], [0], [0, 0, 1, 0], [], []>} : vector<16x32xbf16>, vector<16x32xbf16>, vector<16x16xf32> -> vector<16x16xf32>
    %80 = arith.addf %79, %25 : vector<16x16xf32>
    %cst_25 = arith.constant 7.812500e-03 : f32
    %81 = vector.broadcast %cst_25 : f32 to vector<16x16xf32>
    %82 = arith.mulf %80, %81 : vector<16x16xf32>
    %cst_26 = arith.constant dense<0xFF800000> : vector<16xf32>
    %83 = vector.multi_reduction <maximumf>, %82, %cst_26 [1] : vector<16x16xf32> to vector<16xf32>
    %84 = vector.shape_cast %83 : vector<16xf32> to vector<16x1xf32>
    %85 = vector.broadcast %84 : vector<16x1xf32> to vector<16x16xf32>
    %86 = arith.subf %82, %85 : vector<16x16xf32>
    %87 = math.exp %86 : vector<16x16xf32>
    %cst_27 = arith.constant dense<0.000000e+00> : vector<16xf32>
    %88 = vector.multi_reduction <add>, %87, %cst_27 [1] : vector<16x16xf32> to vector<16xf32>
    %89 = vector.shape_cast %88 : vector<16xf32> to vector<16x1xf32>
    %90 = tpu.reciprocal %89 {approx = true} : vector<16x1xf32> -> vector<16x1xf32>
    %91 = vector.broadcast %90 : vector<16x1xf32> to vector<16x16xf32>
    %92 = arith.mulf %87, %91 : vector<16x16xf32>
    %93 = arith.truncf %92 : vector<16x16xf32> to vector<16x16xbf16>
    %cst_28 = arith.constant dense<0.000000e+00> : vector<16x32xf32>
    %94 = tpu.matmul %93, %78, %cst_28 {dimension_numbers = #tpu.dot_dimension_numbers<[1], [0], [0], [1], [0, 0, 1, 1], [], []>} : vector<16x16xbf16>, vector<16x32xbf16>, vector<16x32xf32> -> vector<16x32xf32>
    %95 = vector.extract_strided_slice %26 {offsets = [0, 96], sizes = [16, 32], strides = [1, 1]} : vector<16x128xf32> to vector<16x32xf32>
    %96 = arith.truncf %95 : vector<16x32xf32> to vector<16x32xbf16>
    %97 = vector.extract_strided_slice %27 {offsets = [0, 96], sizes = [16, 32], strides = [1, 1]} : vector<16x128xf32> to vector<16x32xf32>
    %98 = arith.truncf %97 : vector<16x32xf32> to vector<16x32xbf16>
    %99 = vector.extract_strided_slice %28 {offsets = [0, 96], sizes = [16, 32], strides = [1, 1]} : vector<16x128xf32> to vector<16x32xf32>
    %100 = arith.truncf %99 : vector<16x32xf32> to vector<16x32xbf16>
    %cst_29 = arith.constant dense<0.000000e+00> : vector<16x16xf32>
    %101 = tpu.matmul %96, %98, %cst_29 {dimension_numbers = #tpu.dot_dimension_numbers<[1], [1], [0], [0], [0, 0, 1, 0], [], []>} : vector<16x32xbf16>, vector<16x32xbf16>, vector<16x16xf32> -> vector<16x16xf32>
    %102 = arith.addf %101, %25 : vector<16x16xf32>
    %cst_30 = arith.constant 7.812500e-03 : f32
    %103 = vector.broadcast %cst_30 : f32 to vector<16x16xf32>
    %104 = arith.mulf %102, %103 : vector<16x16xf32>
    %cst_31 = arith.constant dense<0xFF800000> : vector<16xf32>
    %105 = vector.multi_reduction <maximumf>, %104, %cst_31 [1] : vector<16x16xf32> to vector<16xf32>
    %106 = vector.shape_cast %105 : vector<16xf32> to vector<16x1xf32>
    %107 = vector.broadcast %106 : vector<16x1xf32> to vector<16x16xf32>
    %108 = arith.subf %104, %107 : vector<16x16xf32>
    %109 = math.exp %108 : vector<16x16xf32>
    %cst_32 = arith.constant dense<0.000000e+00> : vector<16xf32>
    %110 = vector.multi_reduction <add>, %109, %cst_32 [1] : vector<16x16xf32> to vector<16xf32>
    %111 = vector.shape_cast %110 : vector<16xf32> to vector<16x1xf32>
    %112 = tpu.reciprocal %111 {approx = true} : vector<16x1xf32> -> vector<16x1xf32>
    %113 = vector.broadcast %112 : vector<16x1xf32> to vector<16x16xf32>
    %114 = arith.mulf %109, %113 : vector<16x16xf32>
    %115 = arith.truncf %114 : vector<16x16xf32> to vector<16x16xbf16>
    %cst_33 = arith.constant dense<0.000000e+00> : vector<16x32xf32>
    %116 = tpu.matmul %115, %100, %cst_33 {dimension_numbers = #tpu.dot_dimension_numbers<[1], [0], [0], [1], [0, 0, 1, 1], [], []>} : vector<16x16xbf16>, vector<16x32xbf16>, vector<16x32xf32> -> vector<16x32xf32>
    %117 = tpu.concatenate %50, %72, %94, %116 in 1 : vector<16x32xf32>, vector<16x32xf32>, vector<16x32xf32>, vector<16x32xf32> -> vector<16x128xf32>
    %c0_34 = arith.constant 0 : index
    %c0_35 = arith.constant 0 : index
    %118 = vector.load %arg8[%c0_34, %c0_35] : memref<32x128xf32, #tpu.memory_space<vmem>>, vector<16x128xf32>
    tpu.vector_store %arg8[%c0_34, %c0_35], %117 {strides = array<i32>} : memref<32x128xf32, #tpu.memory_space<vmem>>, vector<16x128xf32>,
    %c1 = arith.constant 1 : index
    %119 = memref.load %arg1[%c1] : memref<2xi32, #tpu.memory_space<smem>>
    %120 = vector.broadcast %119 : i32 to vector<16x16xi32>
    %121 = arith.cmpi slt, %15, %120 : vector<16x16xi32>
    %122 = vector.broadcast %119 : i32 to vector<16x16xi32>
    %123 = arith.cmpi slt, %16, %122 : vector<16x16xi32>
    %124 = arith.andi %121, %123 : vector<16x16xi1>
    %cst_36 = arith.constant 0.000000e+00 : f32
    %cst_37 = arith.constant -9.99999986E+14 : f32
    %125 = vector.broadcast %cst_36 : f32 to vector<16x16xf32>
    %126 = vector.broadcast %cst_37 : f32 to vector<16x16xf32>
    %127 = arith.select %124, %125, %126 : vector<16x16xi1>, vector<16x16xf32>
    %128 = vector.extract_strided_slice %14 {offsets = [16, 0], sizes = [16, 128], strides = [1, 1]} : vector<32x384xf32> to vector<16x128xf32>
    %129 = vector.extract_strided_slice %14 {offsets = [16, 128], sizes = [16, 128], strides = [1, 1]} : vector<32x384xf32> to vector<16x128xf32>
    %130 = vector.extract_strided_slice %14 {offsets = [16, 256], sizes = [16, 128], strides = [1, 1]} : vector<32x384xf32> to vector<16x128xf32>
    %131 = vector.extract_strided_slice %128 {offsets = [0, 0], sizes = [16, 32], strides = [1, 1]} : vector<16x128xf32> to vector<16x32xf32>
    %132 = arith.truncf %131 : vector<16x32xf32> to vector<16x32xbf16>
    %133 = vector.extract_strided_slice %129 {offsets = [0, 0], sizes = [16, 32], strides = [1, 1]} : vector<16x128xf32> to vector<16x32xf32>
    %134 = arith.truncf %133 : vector<16x32xf32> to vector<16x32xbf16>
    %135 = vector.extract_strided_slice %130 {offsets = [0, 0], sizes = [16, 32], strides = [1, 1]} : vector<16x128xf32> to vector<16x32xf32>
    %136 = arith.truncf %135 : vector<16x32xf32> to vector<16x32xbf16>
    %cst_38 = arith.constant dense<0.000000e+00> : vector<16x16xf32>
    %137 = tpu.matmul %132, %134, %cst_38 {dimension_numbers = #tpu.dot_dimension_numbers<[1], [1], [0], [0], [0, 0, 1, 0], [], []>} : vector<16x32xbf16>, vector<16x32xbf16>, vector<16x16xf32> -> vector<16x16xf32>
    %138 = arith.addf %137, %127 : vector<16x16xf32>
    %cst_39 = arith.constant 7.812500e-03 : f32
    %139 = vector.broadcast %cst_39 : f32 to vector<16x16xf32>
    %140 = arith.mulf %138, %139 : vector<16x16xf32>
    %cst_40 = arith.constant dense<0xFF800000> : vector<16xf32>
    %141 = vector.multi_reduction <maximumf>, %140, %cst_40 [1] : vector<16x16xf32> to vector<16xf32>
    %142 = vector.shape_cast %141 : vector<16xf32> to vector<16x1xf32>
    %143 = vector.broadcast %142 : vector<16x1xf32> to vector<16x16xf32>
    %144 = arith.subf %140, %143 : vector<16x16xf32>
    %145 = math.exp %144 : vector<16x16xf32>
    %cst_41 = arith.constant dense<0.000000e+00> : vector<16xf32>
    %146 = vector.multi_reduction <add>, %145, %cst_41 [1] : vector<16x16xf32> to vector<16xf32>
    %147 = vector.shape_cast %146 : vector<16xf32> to vector<16x1xf32>
    %148 = tpu.reciprocal %147 {approx = true} : vector<16x1xf32> -> vector<16x1xf32>
    %149 = vector.broadcast %148 : vector<16x1xf32> to vector<16x16xf32>
    %150 = arith.mulf %145, %149 : vector<16x16xf32>
    %151 = arith.truncf %150 : vector<16x16xf32> to vector<16x16xbf16>
    %cst_42 = arith.constant dense<0.000000e+00> : vector<16x32xf32>
    %152 = tpu.matmul %151, %136, %cst_42 {dimension_numbers = #tpu.dot_dimension_numbers<[1], [0], [0], [1], [0, 0, 1, 1], [], []>} : vector<16x16xbf16>, vector<16x32xbf16>, vector<16x32xf32> -> vector<16x32xf32>
    %153 = vector.extract_strided_slice %128 {offsets = [0, 32], sizes = [16, 32], strides = [1, 1]} : vector<16x128xf32> to vector<16x32xf32>
    %154 = arith.truncf %153 : vector<16x32xf32> to vector<16x32xbf16>
    %155 = vector.extract_strided_slice %129 {offsets = [0, 32], sizes = [16, 32], strides = [1, 1]} : vector<16x128xf32> to vector<16x32xf32>
    %156 = arith.truncf %155 : vector<16x32xf32> to vector<16x32xbf16>
    %157 = vector.extract_strided_slice %130 {offsets = [0, 32], sizes = [16, 32], strides = [1, 1]} : vector<16x128xf32> to vector<16x32xf32>
    %158 = arith.truncf %157 : vector<16x32xf32> to vector<16x32xbf16>
    %cst_43 = arith.constant dense<0.000000e+00> : vector<16x16xf32>
    %159 = tpu.matmul %154, %156, %cst_43 {dimension_numbers = #tpu.dot_dimension_numbers<[1], [1], [0], [0], [0, 0, 1, 0], [], []>} : vector<16x32xbf16>, vector<16x32xbf16>, vector<16x16xf32> -> vector<16x16xf32>
    %160 = arith.addf %159, %127 : vector<16x16xf32>
    %cst_44 = arith.constant 7.812500e-03 : f32
    %161 = vector.broadcast %cst_44 : f32 to vector<16x16xf32>
    %162 = arith.mulf %160, %161 : vector<16x16xf32>
    %cst_45 = arith.constant dense<0xFF800000> : vector<16xf32>
    %163 = vector.multi_reduction <maximumf>, %162, %cst_45 [1] : vector<16x16xf32> to vector<16xf32>
    %164 = vector.shape_cast %163 : vector<16xf32> to vector<16x1xf32>
    %165 = vector.broadcast %164 : vector<16x1xf32> to vector<16x16xf32>
    %166 = arith.subf %162, %165 : vector<16x16xf32>
    %167 = math.exp %166 : vector<16x16xf32>
    %cst_46 = arith.constant dense<0.000000e+00> : vector<16xf32>
    %168 = vector.multi_reduction <add>, %167, %cst_46 [1] : vector<16x16xf32> to vector<16xf32>
    %169 = vector.shape_cast %168 : vector<16xf32> to vector<16x1xf32>
    %170 = tpu.reciprocal %169 {approx = true} : vector<16x1xf32> -> vector<16x1xf32>
    %171 = vector.broadcast %170 : vector<16x1xf32> to vector<16x16xf32>
    %172 = arith.mulf %167, %171 : vector<16x16xf32>
    %173 = arith.truncf %172 : vector<16x16xf32> to vector<16x16xbf16>
    %cst_47 = arith.constant dense<0.000000e+00> : vector<16x32xf32>
    %174 = tpu.matmul %173, %158, %cst_47 {dimension_numbers = #tpu.dot_dimension_numbers<[1], [0], [0], [1], [0, 0, 1, 1], [], []>} : vector<16x16xbf16>, vector<16x32xbf16>, vector<16x32xf32> -> vector<16x32xf32>
    %175 = vector.extract_strided_slice %128 {offsets = [0, 64], sizes = [16, 32], strides = [1, 1]} : vector<16x128xf32> to vector<16x32xf32>
    %176 = arith.truncf %175 : vector<16x32xf32> to vector<16x32xbf16>
    %177 = vector.extract_strided_slice %129 {offsets = [0, 64], sizes = [16, 32], strides = [1, 1]} : vector<16x128xf32> to vector<16x32xf32>
    %178 = arith.truncf %177 : vector<16x32xf32> to vector<16x32xbf16>
    %179 = vector.extract_strided_slice %130 {offsets = [0, 64], sizes = [16, 32], strides = [1, 1]} : vector<16x128xf32> to vector<16x32xf32>
    %180 = arith.truncf %179 : vector<16x32xf32> to vector<16x32xbf16>
    %cst_48 = arith.constant dense<0.000000e+00> : vector<16x16xf32>
    %181 = tpu.matmul %176, %178, %cst_48 {dimension_numbers = #tpu.dot_dimension_numbers<[1], [1], [0], [0], [0, 0, 1, 0], [], []>} : vector<16x32xbf16>, vector<16x32xbf16>, vector<16x16xf32> -> vector<16x16xf32>
    %182 = arith.addf %181, %127 : vector<16x16xf32>
    %cst_49 = arith.constant 7.812500e-03 : f32
    %183 = vector.broadcast %cst_49 : f32 to vector<16x16xf32>
    %184 = arith.mulf %182, %183 : vector<16x16xf32>
    %cst_50 = arith.constant dense<0xFF800000> : vector<16xf32>
    %185 = vector.multi_reduction <maximumf>, %184, %cst_50 [1] : vector<16x16xf32> to vector<16xf32>
    %186 = vector.shape_cast %185 : vector<16xf32> to vector<16x1xf32>
    %187 = vector.broadcast %186 : vector<16x1xf32> to vector<16x16xf32>
    %188 = arith.subf %184, %187 : vector<16x16xf32>
    %189 = math.exp %188 : vector<16x16xf32>
    %cst_51 = arith.constant dense<0.000000e+00> : vector<16xf32>
    %190 = vector.multi_reduction <add>, %189, %cst_51 [1] : vector<16x16xf32> to vector<16xf32>
    %191 = vector.shape_cast %190 : vector<16xf32> to vector<16x1xf32>
    %192 = tpu.reciprocal %191 {approx = true} : vector<16x1xf32> -> vector<16x1xf32>
    %193 = vector.broadcast %192 : vector<16x1xf32> to vector<16x16xf32>
    %194 = arith.mulf %189, %193 : vector<16x16xf32>
    %195 = arith.truncf %194 : vector<16x16xf32> to vector<16x16xbf16>
    %cst_52 = arith.constant dense<0.000000e+00> : vector<16x32xf32>
    %196 = tpu.matmul %195, %180, %cst_52 {dimension_numbers = #tpu.dot_dimension_numbers<[1], [0], [0], [1], [0, 0, 1, 1], [], []>} : vector<16x16xbf16>, vector<16x32xbf16>, vector<16x32xf32> -> vector<16x32xf32>
    %197 = vector.extract_strided_slice %128 {offsets = [0, 96], sizes = [16, 32], strides = [1, 1]} : vector<16x128xf32> to vector<16x32xf32>
    %198 = arith.truncf %197 : vector<16x32xf32> to vector<16x32xbf16>
    %199 = vector.extract_strided_slice %129 {offsets = [0, 96], sizes = [16, 32], strides = [1, 1]} : vector<16x128xf32> to vector<16x32xf32>
    %200 = arith.truncf %199 : vector<16x32xf32> to vector<16x32xbf16>
    %201 = vector.extract_strided_slice %130 {offsets = [0, 96], sizes = [16, 32], strides = [1, 1]} : vector<16x128xf32> to vector<16x32xf32>
    %202 = arith.truncf %201 : vector<16x32xf32> to vector<16x32xbf16>
    %cst_53 = arith.constant dense<0.000000e+00> : vector<16x16xf32>
    %203 = tpu.matmul %198, %200, %cst_53 {dimension_numbers = #tpu.dot_dimension_numbers<[1], [1], [0], [0], [0, 0, 1, 0], [], []>} : vector<16x32xbf16>, vector<16x32xbf16>, vector<16x16xf32> -> vector<16x16xf32>
    %204 = arith.addf %203, %127 : vector<16x16xf32>
    %cst_54 = arith.constant 7.812500e-03 : f32
    %205 = vector.broadcast %cst_54 : f32 to vector<16x16xf32>
    %206 = arith.mulf %204, %205 : vector<16x16xf32>
    %cst_55 = arith.constant dense<0xFF800000> : vector<16xf32>
    %207 = vector.multi_reduction <maximumf>, %206, %cst_55 [1] : vector<16x16xf32> to vector<16xf32>
    %208 = vector.shape_cast %207 : vector<16xf32> to vector<16x1xf32>
    %209 = vector.broadcast %208 : vector<16x1xf32> to vector<16x16xf32>
    %210 = arith.subf %206, %209 : vector<16x16xf32>
    %211 = math.exp %210 : vector<16x16xf32>
    %cst_56 = arith.constant dense<0.000000e+00> : vector<16xf32>
    %212 = vector.multi_reduction <add>, %211, %cst_56 [1] : vector<16x16xf32> to vector<16xf32>
    %213 = vector.shape_cast %212 : vector<16xf32> to vector<16x1xf32>
    %214 = tpu.reciprocal %213 {approx = true} : vector<16x1xf32> -> vector<16x1xf32>
    %215 = vector.broadcast %214 : vector<16x1xf32> to vector<16x16xf32>
    %216 = arith.mulf %211, %215 : vector<16x16xf32>
    %217 = arith.truncf %216 : vector<16x16xf32> to vector<16x16xbf16>
    %cst_57 = arith.constant dense<0.000000e+00> : vector<16x32xf32>
    %218 = tpu.matmul %217, %202, %cst_57 {dimension_numbers = #tpu.dot_dimension_numbers<[1], [0], [0], [1], [0, 0, 1, 1], [], []>} : vector<16x16xbf16>, vector<16x32xbf16>, vector<16x32xf32> -> vector<16x32xf32>
    %219 = tpu.concatenate %152, %174, %196, %218 in 1 : vector<16x32xf32>, vector<16x32xf32>, vector<16x32xf32>, vector<16x32xf32> -> vector<16x128xf32>
    %c16 = arith.constant 16 : index
    %c0_58 = arith.constant 0 : index
    %220 = vector.load %arg8[%c16, %c0_58] : memref<32x128xf32, #tpu.memory_space<vmem>>, vector<16x128xf32>
    tpu.vector_store %arg8[%c16, %c0_58], %219 {strides = array<i32>} : memref<32x128xf32, #tpu.memory_space<vmem>>, vector<16x128xf32>,
    return
  }
  func.func @transform_0(%arg0: i32, %arg1: memref<2xi32, #tpu.memory_space<smem>>) -> (i32, i32) {
    %c0_i32 = arith.constant 0 : i32
    %c0_i32_0 = arith.constant 0 : i32
    %c0_i32_1 = arith.constant 0 : i32
    return %c0_i32, %c0_i32_0 : i32, i32
  }
  func.func @transform_1(%arg0: i32, %arg1: memref<2xi32, #tpu.memory_space<smem>>) -> (i32, i32) {
    %c0_i32 = arith.constant 0 : i32
    %c0_i32_0 = arith.constant 0 : i32
    %c0_i32_1 = arith.constant 0 : i32
    return %c0_i32, %c0_i32_0 : i32, i32
  }
  func.func @transform_2(%arg0: i32, %arg1: memref<2xi32, #tpu.memory_space<smem>>) -> (i32, i32) {
    %c0_i32 = arith.constant 0 : i32
    %c0_i32_0 = arith.constant 0 : i32
    %c0_i32_1 = arith.constant 0 : i32
    return %c0_i32, %c0_i32_0 : i32, i32
  }
  func.func @transform_3(%arg0: i32, %arg1: memref<2xi32, #tpu.memory_space<smem>>) -> (i32, i32) {
    %c0_i32 = arith.constant 0 : i32
    %c0_i32_0 = arith.constant 0 : i32
    %c0_i32_1 = arith.constant 0 : i32
    return %c0_i32, %c0_i32_0 : i32, i32
  }
  func.func @transform_4(%arg0: i32, %arg1: memref<2xi32, #tpu.memory_space<smem>>) -> (i32, i32) {
    %c0_i32 = arith.constant 0 : i32
    %c0_i32_0 = arith.constant 0 : i32
    %c0_i32_1 = arith.constant 0 : i32
    return %c0_i32, %c0_i32_0 : i32, i32
  }
  func.func @transform_5(%arg0: i32, %arg1: memref<2xi32, #tpu.memory_space<smem>>) -> (i32, i32) {
    %c0_i32 = arith.constant 0 : i32
    %c0_i32_0 = arith.constant 0 : i32
    %c0_i32_1 = arith.constant 0 : i32
    return %c0_i32, %c0_i32_0 : i32, i32
  }
  func.func @transform_6(%arg0: i32, %arg1: memref<2xi32, #tpu.memory_space<smem>>) -> (i32, i32) {
    %c0_i32 = arith.constant 0 : i32
    %c0_i32_0 = arith.constant 0 : i32
    %c0_i32_1 = arith.constant 0 : i32
    return %c0_i32, %c0_i32_0 : i32, i32
  }
}

</mosaic_0001>

<bundles_post_ra>
// kernel: tpu_custom_call.1
= control target key start
LH: loop header
LB: loop body
LE: loop exit
PB: predicated region body
PF: predicated region fallthrough
CT: control target
= control target key end

     0   :  { %s1886_s24 = smov [#allocation3]   ;;  %s2286_s0 = inlined_call_operand.hbm [shape: s32[2], index: 0, kind: input, shape index: {}]   ;;  %s2287_s1 = inlined_call_operand.hbm [shape: f32[32,128], index: 1, kind: input, shape index: {}]   ;;  %s2288_s2 = inlined_call_operand.hbm [shape: f32[32,128], index: 2, kind: input, shape index: {}]   ;;  %s2289_s3 = inlined_call_operand.vmem [shape: f32[1,128], index: 3, kind: input, shape index: {}]   ;;  %s2290_s4 = inlined_call_operand.vmem [shape: f32[1,128], index: 4, kind: input, shape index: {}]   ;;  %s2291_s5 = inlined_call_operand.hbm [shape: bf16[128,384], index: 5, kind: input, shape index: {}]   ;;  %s2292_s6 = inlined_call_operand.vmem [shape: f32[1,384], index: 6, kind: input, shape index: {}]   ;;  %s2293_s7 = inlined_call_operand.hbm [shape: f32[32,128], index: 7, kind: output, shape index: {}]  }
   0x1   :  { %13 = dma.hbm_to_smem %s2286_s0, 16, %s1886_s24, [#allocation2] }
   0x2   :  { %1878 = dma.done.wait [#allocation2], 16 }
   0x3   :  { %1879 = vsyncadd [#allocation2], 4294967280 }
   0x4   :  { %15 = sfence }
   0x5   :  { %16 = vsyncpa [#allocation5], 0 }
   0x6   :  { %17 = vsyncpa [#allocation8], 0 }
   0x7   :  { %18 = vsyncpa [#allocation6], 0  ;;  %s1887_s27 = smov [#allocation7]   ;;  %s1888_s29 = smov [#allocation4]  }
   0x8   :  { %s36_s28 = sshll.u32 %s1887_s27, 4  ;;  %s24_s30 = sshll.u32 %s1888_s29, 4  ;;  %s37_s28 = int_to_ptr.vmem [resolvable:$true] %s36_s28  ;;  %s25_s30 = int_to_ptr.vmem [resolvable:$true] %s24_s30 }
   0x9   :  { %s1806_s8 = scalar_lea.vmem %s37_s28, 512  ;;  %p1811_p1 = scmp.lt.s32.totalorder %s37_s28, %s37_s28 }
   0xa   :  { %p1807_p0 = scmp.ne.s32.totalorder %s37_s28, %s1806_s8  ;;  %p1812_p2 = scmp.lt.s32.totalorder %s1806_s8, %s1806_s8 }
   0xc   :  { %p1813_p3 = por %p1812_p2, %p1811_p1 }
   0xe   :  { %p1814_p4 = pnand %p1813_p3, %p1807_p0 }
  0x10   :  { %1817 = shalt.err (!%p1814_p4)
}
  0x11   :  { %s1889_s0 = smov 128   ;;  %s1890_s9 = smov 8  }
  0x12   :  { %42 = dma.hbm_to_vmem [thread:$0]  %s2288_s2, 512, %s37_s28, [#allocation8], %s1889_s0, %s1889_s0, %s1890_s9  }
  0x13   :  { %s1826_s12 = scalar_lea.vmem %s25_s30, 512  ;;  %p1831_p6 = scmp.lt.s32.totalorder %s25_s30, %s25_s30 }
  0x14   :  { %p1827_p5 = scmp.ne.s32.totalorder %s25_s30, %s1826_s12  ;;  %p1832_p7 = scmp.lt.s32.totalorder %s1826_s12, %s1826_s12 }
  0x16   :  { %p1833_p8 = por %p1832_p7, %p1831_p6 }
  0x18   :  { %p1834_p9 = pnand %p1833_p8, %p1827_p5 }
  0x1a   :  { %1837 = shalt.err (!%p1834_p9)
}
  0x1b   :  { %30 = dma.hbm_to_vmem [thread:$0]  %s2287_s1, 512, %s25_s30, [#allocation5], %s1889_s0, %s1889_s0, %s1890_s9  }
  0x1c   :  { %s1891_s15 = smov [#allocation9]  }
  0x1d   :  { %s52_s16 = sshll.u32 %s1891_s15, 4  ;;  %s53_s16 = int_to_ptr.vmem [resolvable:$true] %s52_s16 }
  0x1e   :  { %s1846_s17 = scalar_lea.vmem %s53_s16, 3072  ;;  %p1851_p11 = scmp.lt.s32.totalorder %s53_s16, %s53_s16 }
  0x1f   :  { %p1847_p10 = scmp.ne.s32.totalorder %s53_s16, %s1846_s17  ;;  %p1852_p12 = scmp.lt.s32.totalorder %s1846_s17, %s1846_s17 }
  0x21   :  { %p1853_p13 = por %p1852_p12, %p1851_p11 }
  0x23   :  { %p1854_p0 = pnand %p1853_p13, %p1847_p10 }
  0x25   :  { %1857 = shalt.err (!%p1854_p0)
}
  0x26   :  { %s1892_s2 = smov 192   ;;  %s1893_s18 = smov 12  }
  0x27   :  { %58 = dma.hbm_to_vmem [thread:$0]  %s2291_s5, 3072, %s53_s16, [#allocation8], %s1892_s2, %s1892_s2, %s1893_s18  }
  0x28   :  { %1880 = dma.done.wait [#allocation5], 512  }
  0x29   :  { %1881 = vsyncadd [#allocation5], 4294966784 }
  0x2a   :  { %1882 = dma.done.wait [#allocation8], 3584  }
  0x2b   :  { %1883 = vsyncadd [#allocation8], 4294963712  ;;  %v1894_v0 = vmov 0   ;;  %v1694_v1 = vld [vmem:[#allocation9 + $0xac] ss:$12 sps:$4 sm:$0xff]   ;;  %v72_v10 = vld [vmem:[#allocation4] sm:$0xff]  ;;  %v141_v50 = vlaneseq }
  0x2c   :  { %316 = vmatprep.mubr.bf16.mxu0 %v1894_v0  ;;  %v1696_v2 = vld [vmem:[#allocation9 + $0xa8] ss:$12 sps:$4 sm:$0xff]   ;;  %284 = vmatprep.subr.bf16.mxu0 %v1694_v1  ;;  %v1699_v4 = vld [vmem:[#allocation9 + $0x90] ss:$12 sps:$4 sm:$0xff]   ;;  %v1702_v6 = vld [vmem:[#allocation9 + $0x78] ss:$12 sps:$4 sm:$0xff]  }
  0x2d   :  { %v1697_v3 = vld [vmem:[#allocation9 + $0x94] ss:$12 sps:$4 sm:$0xff]   ;;  %285 = vmatpush1.bf16.msra.mxu0 %v1696_v2  ;;  %v1700_v5 = vld [vmem:[#allocation9 + $0x7c] ss:$12 sps:$4 sm:$0xff]   ;;  %v1703_v7 = vld [vmem:[#allocation9 + $0x64] ss:$12 sps:$4 sm:$0xff]  }
  0x2e   :  { %286 = vmatprep.subr.bf16.mxu0 %v1697_v3  ;;  %v1705_v8 = vld [vmem:[#allocation9 + $0x60] ss:$12 sps:$4 sm:$0xff]   ;;  %v1708_v16 = vld [vmem:[#allocation9 + $0x48] ss:$12 sps:$4 sm:$0xff]   ;;  %v1718_v21 = vld [vmem:[#allocation9 + $0xb0] ss:$12 sps:$4 sm:$0xff]  }
  0x2f   :  { %v1477_v9 = vld [vmem:[%s2289_s3] ss:$0 sm:$0xff]  ;;  %v73_v11 = vld [vmem:[#allocation4 + $0x8] sm:$0xff]  ;;  %v1719_v22 = vld [vmem:[#allocation9 + $0x98] ss:$12 sps:$4 sm:$0xff]   ;;  %1562 = vmatprep.subr.bf16.mxu1 %v1718_v21  ;;  %v1895_v49 = vmov 0.0  }
  0x30   :  { %v1478_v12 = vld [vmem:[%s2290_s4] ss:$0 sm:$0xff]  ;;  %v1706_v13 = vld [vmem:[#allocation9 + $0x4c] ss:$12 sps:$4 sm:$0xff]   ;;  %v82_v14 = vmul.f32 %v1477_v9, %v72_v10  ;;  %v83_v15 = vmul.f32 %v1477_v9, %v73_v11  ;;  %1563 = vmatpush3.bf16.msra.mxu1 %v1718_v21  ;;  %v1711_v28 = vld [vmem:[#allocation9 + $0x30] ss:$12 sps:$4 sm:$0xff]  }
  0x31   :  { %287 = vmatpush1.bf16.msra.mxu0 %v1699_v4  ;;  %v97_v17 = vld [vmem:[#allocation7] sm:$0xff]  ;;  %v98_v18 = vld [vmem:[#allocation7 + $0x8] sm:$0xff]  ;;  %1564 = vmatprep.subr.bf16.mxu1 %v1719_v22  ;;  %v74_v32 = vld [vmem:[#allocation4 + $0x10] sm:$0xff]  ;;  %vm1896_vm0 = vmmov 0   ;;  %v1975_v51 = vshrl.u32 %v141_v50, 7  ;;  %vm403_vm1 = vcmask 261120  }
  0x32   :  { %288 = vmatprep.subr.bf16.mxu0 %v1700_v5  ;;  %v93_v19 = vadd.f32 %v1478_v12, %v82_v14  ;;  %v94_v20 = vadd.f32 %v1478_v12, %v83_v15  ;;  %v1709_v23 = vld [vmem:[#allocation9 + $0x34] ss:$12 sps:$4 sm:$0xff]   ;;  %v1712_v29 = vld [vmem:[#allocation9 + $0x1c] ss:$12 sps:$4 sm:$0xff]   ;;  %v1714_v31 = vld [vmem:[#allocation9 + $0x18] ss:$12 sps:$4 sm:$0xff]   ;;  %v84_v35 = vmul.f32 %v1477_v9, %v74_v32 }
  0x33   :  { %v1720_v27 = vld [vmem:[#allocation9 + $0x80] ss:$12 sps:$4 sm:$0xff]   ;;  %v1721_v30 = vld [vmem:[#allocation9 + $0x68] ss:$12 sps:$4 sm:$0xff]   ;;  %v75_v33 = vld [vmem:[#allocation4 + $0x18] sm:$0xff]  ;;  %v147_v52 = vsub.s32 1, %v1975_v51 }
  0x34   :  { %v101_v24 = vadd.f32 %v97_v17, %v93_v19  ;;  %v102_v25 = vadd.f32 %v98_v18, %v94_v20  ;;  %1565 = vmatpush3.bf16.msra.mxu1 %v1719_v22  ;;  %v1715_v34 = vld [vmem:[#allocation9 + $0x4] ss:$12 sps:$4 sm:$0xff]   ;;  %v85_v36 = vmul.f32 %v1477_v9, %v75_v33  ;;  %v1717_v38 = vld [vmem:[#allocation9] ss:$12 sps:$4 sm:$0xff]   ;;  %v95_v39 = vadd.f32 %v1478_v12, %v84_v35  ;;  %v100_v43 = vld [vmem:[#allocation7 + $0x18] sm:$0xff]  ;;  %s1897_s23 = smov 64  }
  0x35   :  { %289 = vmatpush1.bf16.msra.mxu0 %v1702_v6  ;;  %1566 = vmatprep.subr.bf16.mxu1 %v1720_v27  ;;  %v1722_v37 = vld [vmem:[#allocation9 + $0x50] ss:$12 sps:$4 sm:$0xff]   ;;  %v1723_v41 = vld [vmem:[#allocation9 + $0x38] ss:$12 sps:$4 sm:$0xff]   ;;  %v1724_v47 = vld [vmem:[#allocation9 + $0x20] ss:$12 sps:$4 sm:$0xff]  }
  0x36   :  { %290 = vmatprep.subr.bf16.mxu0 %v1703_v7  ;;  %v105_v26 = vpack.c.bf16 %v102_v25, %v101_v24  ;;  %v96_v40 = vadd.f32 %v1478_v12, %v85_v36  ;;  %v99_v42 = vld [vmem:[#allocation7 + $0x10] sm:$0xff]  ;;  %v139_v54 = vld [vmem:[%s2292_s6] sm:$0x7]  ;;  %v143_v56 = vsub.s32 0, %v1975_v51  ;;  %s1898_s24 = smov 96   ;;  %s1899_s6 = smov 32  }
  0x37   :  { %v103_v44 = vadd.f32 %v99_v42, %v95_v39  ;;  %v1725_v48 = vld [vmem:[#allocation9 + $0x8] ss:$12 sps:$4 sm:$0xff]   ;;  %v148_v57 = vrot.slane %v139_v54, %v147_v52  ;;  %v151_v14 = vsub.s32 2, %v1975_v51  ;;  %s391_s25 = sld [smem:[#allocation3]]  ;;  %vm453_vm7 = vcmask 130048   ;;  %s1901_s27 = smov [#allocation10]  }
  0x38   :  { %1578 = vmatprep.mubr.bf16.mxu1 %v105_v26  ;;  %1567 = vmatpush3.bf16.msra.mxu1 %v1720_v27  ;;  %v104_v45 = vadd.f32 %v100_v43, %v96_v40  ;;  %v144_v60 = vrot.slane %v139_v54, %v143_v56  ;;  %s1511_s26 = sld [smem:[#allocation3 + $0x1]]  ;;  %vm919_vm13 = vcmask 523264   ;;  %vm922_vm14 = vcmask 785408   ;;  %s1464_s28 = sshll.u32 %s1901_s27, 4  ;;  %s1465_s28 = int_to_ptr.vmem [resolvable:$true] %s1464_s28 }
  0x39   :  { %291 = vmatpush1.bf16.msra.mxu0 %v1705_v8  ;;  %1568 = vmatprep.subr.bf16.mxu1 %v1721_v30  ;;  %v152_v15 = vrot.slane %v139_v54, %v151_v14  ;;  %s1858_s29 = scalar_lea.vmem %s1465_s28, 512  ;;  %p1863_p2 = scmp.lt.s32.totalorder %s1465_s28, %s1465_s28 }
  0x3a   :  { %292 = vmatprep.subr.bf16.mxu0 %v1706_v13  ;;  %v106_v46 = vpack.c.bf16 %v104_v45, %v103_v44  ;;  %v2039_v45 = vand.u32 127, %v141_v50  ;;  %p1859_p1 = scmp.ne.s32.totalorder %s1465_s28, %s1858_s29  ;;  %p1864_p3 = scmp.lt.s32.totalorder %s1858_s29, %s1858_s29 }
  0x3c   :  { %1569 = vmatpush3.bf16.msra.mxu1 %v1721_v30  ;;  %p1865_p4 = por %p1864_p3, %p1863_p2 }
  0x3d   :  { %293 = vmatpush1.bf16.msra.mxu0 %v1708_v16  ;;  %1570 = vmatprep.subr.bf16.mxu1 %v1722_v37 }
  0x3e   :  { %294 = vmatprep.subr.bf16.mxu0 %v1709_v23  ;;  %p1866_p5 = pnand %p1865_p4, %p1859_p1 }
  0x40   :  { %1571 = vmatpush3.bf16.msra.mxu1 %v1722_v37 }
  0x41   :  { %295 = vmatpush1.bf16.msra.mxu0 %v1711_v28  ;;  %1572 = vmatprep.subr.bf16.mxu1 %v1723_v41 }
  0x42   :  { %296 = vmatprep.subr.bf16.mxu0 %v1712_v29 }
  0x44   :  { %1573 = vmatpush3.bf16.msra.mxu1 %v1723_v41 }
  0x45   :  { %297 = vmatpush1.bf16.msra.mxu0 %v1714_v31  ;;  %1574 = vmatprep.subr.bf16.mxu1 %v1724_v47 }
  0x46   :  { %298 = vmatprep.subr.bf16.mxu0 %v1715_v34 }
  0x48   :  { %1575 = vmatpush3.bf16.msra.mxu1 %v1724_v47  ;;  %v388_v47 = vadd.s32 8, %v1975_v51 }
  0x49   :  { %299 = vmatpush1.bf16.msra.mxu0 %v1717_v38  ;;  %1576 = vmatprep.subr.bf16.mxu1 %v1725_v48 }
  0x4a   :  { %1588 = vmatprep.subr.bf16.mxu0 %v1895_v49 }
  0x4c   :  { %317 = vmatmul.mubr.bf16.vlgmr.msra.gmra.mxu0 %v105_v26  ;;  %1577 = vmatpush3.bf16.msra.mxu1 %v1725_v48  ;;  %v1900_v48 = vmov -1e+15  }
  0x4d   :  { %326 = vmatprep.mubr.bf16.mxu0 %v1894_v0  ;;  %1582 = vmatprep.subr.bf16.mxu1 %v1895_v49 }
  0x4f   :  { %1579 = vmatmul.mubr.bf16.vlgmr.msra.gmra.mxu1 %v106_v46 }
  0x50   :  { %1584 = vmatprep.mubr.msk.bf16.mxu1 %vm1896_vm0, %v1895_v49 }
  0x54   :  { %327 = vmatmul.mubr.bf16.gmra.mxu0 %v106_v46  ;;  %v392_v46 = vstv %s391_s25 }
  0x55   :  { %1590 = vmatprep.mubr.msk.bf16.mxu0 %vm1896_vm0, %v1895_v49  ;;  %vm393_vm2 = vcmp.lt.s32.totalorder %v1975_v51, %v392_v46  ;;  %vm395_vm3 = vcmp.lt.s32.totalorder %v2039_v45, %v392_v46  ;;  %vm394_vm5 = vcmp.lt.s32.totalorder %v388_v47, %v392_v46 }
  0x56   :  { %vm396_vm4 = vmand %vm393_vm2, %vm395_vm3 }
  0x57   :  { %v398_v52 = vsel %vm396_vm4, 0.0, %v1900_v48  ;;  %vm397_vm6 = vmand %vm394_vm5, %vm395_vm3 }
  0x58   :  { %v399_v56 = vsel %vm397_vm6, 0.0, %v1900_v48 }
 0x10c   :  { %v318_v53 = vpop.f32.mrf.mxu0 }
 0x10d   :  { %v319_v3 = vadd.f32 %v318_v53, %v144_v60 }
 0x10e   :  { %v320_v55 = vpop.f32.mrf.mxu0 }
 0x10f   :  { %v321_v61 = vadd.f32 %v320_v55, %v148_v57  ;;  %v1580_v16 = vpop.f32.mrf.mxu1 }
 0x110   :  { %v322_v58 = vpop.f32.mrf.mxu0  ;;  %v380_v17 = vadd.f32 %v1580_v16, %v152_v15 }
 0x111   :  { %v323_v0 = vadd.f32 %v322_v58, %v144_v60  ;;  %v371_v18 = vpop.f32.mrf.mxu1 }
 0x112   :  { %v324_v59 = vpop.f32.mrf.mxu0  ;;  %v372_v20 = vadd.f32 %v371_v18, %v152_v15 }
 0x113   :  { %v325_v62 = vadd.f32 %v324_v59, %v148_v57  ;;  %v400_v6 = vpack.c.bf16 %v323_v0, %v319_v3  ;;  %v1581_v19 = vpop.f32.mrf.mxu1 }
 0x114   :  { %v328_v63 = vpop.f32.mrf.mxu0  ;;  %v383_v21 = vadd.f32 %v1581_v19, %v152_v15 }
 0x115   :  { %v401_v1 = vpack.c.bf16 %v325_v62, %v321_v61  ;;  %v329_v7 = vadd.f32 %v328_v63, %v144_v60  ;;  %v374_v22 = vpop.f32.mrf.mxu1 }
 0x116   :  { %v330_v2 = vpop.f32.mrf.mxu0  ;;  %v2000_v23 = vpack.c.bf16 %v383_v21, %v380_v17  ;;  %v375_v24 = vadd.f32 %v374_v22, %v152_v15 }
 0x117   :  { %649 = vrot.lane.b32.xlu1 %v401_v1, %s1897_s23  ;;  %525 = vrot.lane.b32.xlu0 %v401_v1, %s1898_s24  ;;  %v408_v4 = vsel %vm403_vm1, %v401_v1, 0  ;;  %v331_v9 = vadd.f32 %v330_v2, %v148_v57 }
 0x118   :  { %1583 = vmatpush3.bf16.xpose.msra.mxu1 %v408_v4  ;;  %v332_v5 = vpop.f32.mrf.mxu0  ;;  %v2002_v25 = vpack.c.bf16 %v375_v24, %v372_v20  ;;  %v928_v24 = vstv %s1511_s26 }
 0x119   :  { %1594 = vmatprep.subr.bf16.mxu1 %v1895_v49  ;;  %v333_v10 = vadd.f32 %v332_v5, %v144_v60  ;;  %vm930_vm8 = vcmp.lt.s32.totalorder %v388_v47, %v928_v24  ;;  %vm931_vm9 = vcmp.lt.s32.totalorder %v2039_v45, %v928_v24  ;;  %vm929_vm11 = vcmp.lt.s32.totalorder %v1975_v51, %v928_v24 }
 0x11a   :  { %v334_v8 = vpop.f32.mrf.mxu0  ;;  %1589 = vmatpush3.bf16.msra.mxu0 %v2002_v25  ;;  %vm933_vm10 = vmand %vm930_vm8, %vm931_vm9 }
 0x11b   :  { %647 = vrot.lane.b32.xlu1 %v400_v6, %s1897_s23  ;;  %522 = vrot.lane.b32.xlu0 %v400_v6, %s1898_s24  ;;  %v335_v11 = vadd.f32 %v334_v8, %v148_v57  ;;  %v936_v12 = vpack.c.bf16 %v333_v10, %v329_v7  ;;  %vm932_vm12 = vmand %vm929_vm11, %vm931_vm9 }
 0x11c   :  { %1600 = vmatprep.subr.bf16.mxu0 %v1895_v49 }
 0x11d   :  { %v937_v13 = vpack.c.bf16 %v335_v11, %v331_v9 }
 0x11f   :  { %770 = vrot.lane.b32.xlu1 %v400_v6, %s1899_s6  ;;  %772 = vrot.lane.b32.xlu0 %v401_v1, %s1899_s6  ;;  %v943_v35 = vsel %vm403_vm1, %v937_v13, 0 }
 0x120   :  { %1585 = vmatmul.mubr.msk.bf16.vlgmr.msra.gmra.mxu1 %vm403_vm1, %v400_v6 }
 0x121   :  { %1596 = vmatprep.mubr.msk.bf16.mxu1 %vm1896_vm0, %v1895_v49 }
 0x123   :  { %1059 = vrot.lane.b32.xlu0 %v937_v13, %s1898_s24  ;;  %1056 = vrot.lane.b32.xlu1 %v936_v12, %s1898_s24 }
 0x127   :  { %1183 = vrot.lane.b32.xlu0 %v937_v13, %s1897_s23  ;;  %1181 = vrot.lane.b32.xlu1 %v936_v12, %s1897_s23 }
 0x12b   :  { %1306 = vrot.lane.b32.xlu0 %v937_v13, %s1899_s6  ;;  %1304 = vrot.lane.b32.xlu1 %v936_v12, %s1899_s6 }
 0x189   :  { %v526_v26 = vpop.permute.xlu0 %525  ;;  %v650_v28 = vpop.permute.xlu1 %649 }
 0x18a   :  { %v531_v27 = vsel %vm403_vm1, %v526_v26, 0  ;;  %v655_v30 = vsel %vm403_vm1, %v650_v28, 0 }
 0x18b   :  { %1595 = vmatpush3.bf16.xpose.msra.mxu1 %v531_v27 }
 0x18c   :  { %1606 = vmatprep.subr.bf16.mxu1 %v1895_v49 }
 0x18d   :  { %v523_v29 = vpop.permute.xlu0 %522  ;;  %v648_v32 = vpop.permute.xlu1 %647 }
 0x191   :  { %v773_v31 = vpop.permute.xlu0 %772  ;;  %v771_v34 = vpop.permute.xlu1 %770 }
 0x192   :  { %1597 = vmatmul.mubr.msk.bf16.vlgmr.msra.gmra.mxu1 %vm403_vm1, %v523_v29  ;;  %v778_v33 = vsel %vm403_vm1, %v773_v31, 0 }
 0x193   :  { %1607 = vmatpush3.bf16.xpose.msra.mxu1 %v655_v30  ;;  %1608 = vmatprep.mubr.msk.bf16.mxu1 %vm1896_vm0, %v1895_v49 }
 0x194   :  { %1618 = vmatprep.subr.bf16.mxu1 %v1895_v49 }
 0x195   :  { %v1060_v36 = vpop.permute.xlu0 %1059  ;;  %v1057_v39 = vpop.permute.xlu1 %1056 }
 0x196   :  { %v1065_v37 = vsel %vm403_vm1, %v1060_v36, 0 }
 0x199   :  { %v1184_v38 = vpop.permute.xlu0 %1183  ;;  %v1182_v42 = vpop.permute.xlu1 %1181 }
 0x19a   :  { %1609 = vmatmul.mubr.msk.bf16.vlgmr.msra.gmra.mxu1 %vm403_vm1, %v648_v32  ;;  %v1189_v40 = vsel %vm403_vm1, %v1184_v38, 0 }
 0x19b   :  { %1619 = vmatpush3.bf16.xpose.msra.mxu1 %v778_v33  ;;  %1620 = vmatprep.mubr.msk.bf16.mxu1 %vm1896_vm0, %v1895_v49 }
 0x19c   :  { %1630 = vmatprep.subr.bf16.mxu1 %v1895_v49 }
 0x19d   :  { %v1307_v41 = vpop.permute.xlu0 %1306  ;;  %v1305_v44 = vpop.permute.xlu1 %1304 }
 0x19e   :  { %v1312_v43 = vsel %vm403_vm1, %v1307_v41, 0 }
 0x1a2   :  { %1621 = vmatmul.mubr.msk.bf16.vlgmr.msra.gmra.mxu1 %vm403_vm1, %v771_v34  ;;  %v935_v34 = vsel %vm933_vm10, 0.0, %v1900_v48 }
 0x1a3   :  { %1631 = vmatpush3.bf16.xpose.msra.mxu1 %v943_v35  ;;  %1632 = vmatprep.mubr.msk.bf16.mxu1 %vm1896_vm0, %v1895_v49 }
 0x1a4   :  { %1642 = vmatprep.subr.bf16.mxu1 %v1895_v49 }
 0x1aa   :  { %1633 = vmatmul.mubr.msk.bf16.vlgmr.msra.gmra.mxu1 %vm403_vm1, %v936_v12 }
 0x1ab   :  { %1643 = vmatpush3.bf16.xpose.msra.mxu1 %v1065_v37  ;;  %1644 = vmatprep.mubr.msk.bf16.mxu1 %vm1896_vm0, %v1895_v49 }
 0x1ac   :  { %1654 = vmatprep.subr.bf16.mxu1 %v1895_v49 }
 0x1b2   :  { %1645 = vmatmul.mubr.msk.bf16.vlgmr.msra.gmra.mxu1 %vm403_vm1, %v1057_v39 }
 0x1b3   :  { %1655 = vmatpush3.bf16.xpose.msra.mxu1 %v1189_v40  ;;  %1656 = vmatprep.mubr.msk.bf16.mxu1 %vm1896_vm0, %v1895_v49 }
 0x1b4   :  { %1666 = vmatprep.subr.bf16.mxu1 %v1895_v49 }
 0x1ba   :  { %1657 = vmatmul.mubr.msk.bf16.vlgmr.msra.gmra.mxu1 %vm403_vm1, %v1182_v42 }
 0x1bb   :  { %1667 = vmatpush3.bf16.xpose.msra.mxu1 %v1312_v43  ;;  %1668 = vmatprep.mubr.msk.bf16.mxu1 %vm1896_vm0, %v1895_v49 }
 0x1c2   :  { %1669 = vmatmul.mubr.msk.bf16.vlgmr.msra.gmra.mxu1 %vm403_vm1, %v1305_v44 }
 0x1e0   :  { %v444_v53 = vpop.f32.mrf.mxu1 }
 0x1e1   :  { %v445_v54 = vadd.f32 %v444_v53, %v398_v52 }
 0x1e2   :  { %v1586_v55 = vpop.f32.mrf.mxu1 }
 0x1e3   :  { %v2046_v50 = vmul.f32 0.0078125, %v445_v54 }
 0x1e4   :  { %v447_v57 = vpop.f32.mrf.mxu1 }
 0x1e5   :  { %v448_v58 = vadd.f32 %v447_v57, %v399_v56  ;;  %v454_v59 = vsel %vm453_vm7, %v2046_v50, -inf }
 0x1e6   :  { %455 = vmax.xlane.f32.xlu0 %v454_v59  ;;  %v1587_v60 = vpop.f32.mrf.mxu1 }
 0x1e7   :  { %v452_v61 = vmul.f32 0.0078125, %v448_v58 }
 0x1e9   :  { %v457_v62 = vsel %vm453_vm7, %v452_v61, -inf }
 0x1ea   :  { %458 = vmax.xlane.f32.xlu1 %v457_v62 }
 0x252   :  { %v567_v63 = vpop.f32.mrf.mxu1 }
 0x253   :  { %v568_v0 = vadd.f32 %v567_v63, %v398_v52 }
 0x254   :  { %v1598_v1 = vpop.f32.mrf.mxu1 }
 0x255   :  { %v2051_v2 = vmul.f32 0.0078125, %v568_v0 }
 0x256   :  { %v570_v3 = vpop.f32.mrf.mxu1 }
 0x257   :  { %v571_v4 = vadd.f32 %v570_v3, %v399_v56  ;;  %v576_v5 = vsel %vm453_vm7, %v2051_v2, -inf }
 0x258   :  { %577 = vmax.xlane.f32.xlu0 %v576_v5  ;;  %v1599_v6 = vpop.f32.mrf.mxu1 }
 0x259   :  { %v2055_v7 = vmul.f32 0.0078125, %v571_v4 }
 0x25a   :  { %v691_v8 = vpop.f32.mrf.mxu1 }
 0x25b   :  { %v692_v9 = vadd.f32 %v691_v8, %v398_v52  ;;  %v579_v10 = vsel %vm453_vm7, %v2055_v7, -inf }
 0x25c   :  { %580 = vmax.xlane.f32.xlu0 %v579_v10  ;;  %v1610_v11 = vpop.f32.mrf.mxu1 }
 0x25d   :  { %v2059_v12 = vmul.f32 0.0078125, %v692_v9  ;;  %v934_v11 = vsel %vm932_vm12, 0.0, %v1900_v48 }
 0x25e   :  { %v694_v13 = vpop.f32.mrf.mxu1 }
 0x25f   :  { %v695_v14 = vadd.f32 %v694_v13, %v399_v56  ;;  %v700_v15 = vsel %vm453_vm7, %v2059_v12, -inf }
 0x260   :  { %701 = vmax.xlane.f32.xlu1 %v700_v15  ;;  %v1611_v16 = vpop.f32.mrf.mxu1 }
 0x261   :  { %v2063_v17 = vmul.f32 0.0078125, %v695_v14 }
 0x262   :  { %v814_v18 = vpop.f32.mrf.mxu1 }
 0x263   :  { %v815_v19 = vadd.f32 %v814_v18, %v398_v52  ;;  %v703_v20 = vsel %vm453_vm7, %v2063_v17, -inf }
 0x264   :  { %704 = vmax.xlane.f32.xlu0 %v703_v20  ;;  %v1622_v21 = vpop.f32.mrf.mxu1 }
 0x265   :  { %v2067_v22 = vmul.f32 0.0078125, %v815_v19 }
 0x266   :  { %v817_v26 = vpop.f32.mrf.mxu1 }
 0x267   :  { %v818_v27 = vadd.f32 %v817_v26, %v399_v56  ;;  %v823_v28 = vsel %vm453_vm7, %v2067_v22, -inf }
 0x268   :  { %824 = vmax.xlane.f32.xlu1 %v823_v28  ;;  %v1623_v29 = vpop.f32.mrf.mxu1 }
 0x269   :  { %v2072_v30 = vmul.f32 0.0078125, %v818_v27 }
 0x26a   :  { %v979_v31 = vpop.f32.mrf.mxu1 }
 0x26b   :  { %v826_v32 = vsel %vm453_vm7, %v2072_v30, -inf  ;;  %v980_v13 = vadd.f32 %v979_v31, %v934_v11 }
 0x26c   :  { %827 = vmax.xlane.f32.xlu0 %v826_v32  ;;  %v1634_v33 = vpop.f32.mrf.mxu1 }
 0x26d   :  { %v986_v16 = vmul.f32 0.0078125, %v980_v13 }
 0x26e   :  { %v982_v35 = vpop.f32.mrf.mxu1 }
 0x26f   :  { %v983_v36 = vadd.f32 %v982_v35, %v935_v34  ;;  %v456_v9 = vpop.xlane.xlu0 %455  ;;  %v988_v19 = vsel %vm453_vm7, %v986_v16, -inf }
 0x270   :  { %v1635_v37 = vpop.f32.mrf.mxu1  ;;  %v460_v10 = vsub.f32 %v2046_v50, %v456_v9 }
 0x271   :  { %v2079_v38 = vmul.f32 0.0078125, %v983_v36 }
 0x272   :  { %v1101_v39 = vpop.f32.mrf.mxu1  ;;  %v462_v14 = vmul.f32 1.442695, %v460_v10 }
 0x273   :  { %v459_v40 = vpop.xlane.xlu1 %458  ;;  %v991_v41 = vsel %vm453_vm7, %v2079_v38, -inf  ;;  %v1102_v15 = vadd.f32 %v1101_v39, %v934_v11 }
 0x274   :  { %v461_v42 = vsub.f32 %v452_v61, %v459_v40  ;;  %992 = vmax.xlane.f32.xlu0 %v991_v41  ;;  %v1646_v43 = vpop.f32.mrf.mxu1 }
 0x275   :  { %v2106_v18 = vmul.f32 0.0078125, %v1102_v15 }
 0x276   :  { %v464_v44 = vmul.f32 1.442695, %v461_v42  ;;  %v1104_v46 = vpop.f32.mrf.mxu1 }
 0x277   :  { %v1105_v47 = vadd.f32 %v1104_v46, %v935_v34  ;;  %v1110_v45 = vsel %vm453_vm7, %v2106_v18, -inf }
 0x278   :  { %1726 = vpow2.f32 %v464_v44  ;;  %v1647_v52 = vpop.f32.mrf.mxu1 }
 0x279   :  { %v2083_v53 = vmul.f32 0.0078125, %v1105_v47  ;;  %600 = vrot.lane.b32.xlu1 %v2002_v25, %s1898_s24  ;;  %1728 = vpow2.f32 %v462_v14 }
 0x27a   :  { %v1225_v54 = vpop.f32.mrf.mxu1 }
 0x27b   :  { %v1113_v55 = vsel %vm453_vm7, %v2083_v53, -inf  ;;  %v1226_v51 = vadd.f32 %v1225_v54, %v934_v11 }
 0x27c   :  { %1114 = vmax.xlane.f32.xlu0 %v1113_v55  ;;  %v1658_v56 = vpop.f32.mrf.mxu1 }
 0x27d   :  { %v2109_v20 = vmul.f32 0.0078125, %v1226_v51 }
 0x27e   :  { %v1228_v57 = vpop.f32.mrf.mxu1 }
 0x27f   :  { %v1229_v58 = vadd.f32 %v1228_v57, %v935_v34  ;;  %v1234_v48 = vsel %vm453_vm7, %v2109_v20, -inf }
 0x280   :  { %v1659_v59 = vpop.f32.mrf.mxu1 }
 0x281   :  { %v2089_v60 = vmul.f32 0.0078125, %v1229_v58 }
 0x282   :  { %v1348_v61 = vpop.f32.mrf.mxu1 }
 0x283   :  { %v1237_v62 = vsel %vm453_vm7, %v2089_v60, -inf  ;;  %v1349_v50 = vadd.f32 %v1348_v61, %v934_v11 }
 0x284   :  { %1238 = vmax.xlane.f32.xlu0 %v1237_v62  ;;  %v1670_v63 = vpop.f32.mrf.mxu1 }
 0x285   :  { %v2093_v0 = vpop.eup %1726  ;;  %v2117_v24 = vmul.f32 0.0078125, %v1349_v50 }
 0x286   :  { %v1351_v1 = vpop.f32.mrf.mxu1  ;;  %v469_v4 = vsel %vm453_vm7, %v2093_v0, 0.0  ;;  %v2115_v21 = vpop.eup %1728 }
 0x287   :  { %v1352_v3 = vadd.f32 %v1351_v1, %v935_v34  ;;  %v466_v26 = vsel %vm453_vm7, %v2115_v21, 0.0  ;;  %v1357_v27 = vsel %vm453_vm7, %v2117_v24, -inf }
 0x288   :  { %470 = vadd.xlane.f32.xlu0 %v469_v4  ;;  %v1671_v5 = vpop.f32.mrf.mxu1 }
 0x289   :  { %v2097_v6 = vmul.f32 0.0078125, %v1352_v3 }
 0x28b   :  { %v1360_v8 = vsel %vm453_vm7, %v2097_v6, -inf }
 0x28c   :  { %1361 = vmax.xlane.f32.xlu0 %v1360_v8 }
 0x29d   :  { %989 = vmax.xlane.f32.xlu1 %v988_v19 }
 0x2a1   :  { %1111 = vmax.xlane.f32.xlu1 %v1110_v45 }
 0x2a5   :  { %1235 = vmax.xlane.f32.xlu1 %v1234_v48 }
 0x2a9   :  { %467 = vadd.xlane.f32.xlu1 %v466_v26 }
 0x2ad   :  { %1358 = vmax.xlane.f32.xlu1 %v1357_v27 }
 0x2e1   :  { %v578_v28 = vpop.xlane.xlu0 %577 }
 0x2e2   :  { %v582_v29 = vsub.f32 %v2051_v2, %v578_v28 }
 0x2e4   :  { %v584_v31 = vmul.f32 1.442695, %v582_v29 }
 0x2e5   :  { %v581_v32 = vpop.xlane.xlu0 %580 }
 0x2e6   :  { %1730 = vpow2.f32 %v584_v31  ;;  %v583_v33 = vsub.f32 %v2055_v7, %v581_v32 }
 0x2e8   :  { %v586_v34 = vmul.f32 1.442695, %v583_v33 }
 0x2e9   :  { %v702_v2 = vpop.xlane.xlu1 %701 }
 0x2ea   :  { %1732 = vpow2.f32 %v586_v34  ;;  %v706_v7 = vsub.f32 %v2059_v12, %v702_v2 }
 0x2ec   :  { %v708_v43 = vmul.f32 1.442695, %v706_v7 }
 0x2ed   :  { %v705_v40 = vpop.xlane.xlu0 %704 }
 0x2ee   :  { %v707_v42 = vsub.f32 %v2063_v17, %v705_v40  ;;  %1734 = vpow2.f32 %v708_v43 }
 0x2f0   :  { %v710_v47 = vmul.f32 1.442695, %v707_v42 }
 0x2f1   :  { %v825_v41 = vpop.xlane.xlu1 %824 }
 0x2f2   :  { %v829_v44 = vsub.f32 %v2067_v22, %v825_v41  ;;  %1736 = vpow2.f32 %v710_v47 }
 0x2f3   :  { %v2125_v35 = vpop.eup %1730 }
 0x2f4   :  { %v588_v36 = vsel %vm453_vm7, %v2125_v35, 0.0  ;;  %v831_v52 = vmul.f32 1.442695, %v829_v44 }
 0x2f5   :  { %589 = vadd.xlane.f32.xlu1 %v588_v36  ;;  %v828_v46 = vpop.xlane.xlu0 %827  ;;  %v2142_v57 = vpop.permute.xlu1 %600 }
 0x2f6   :  { %v830_v54 = vsub.f32 %v2072_v30, %v828_v46  ;;  %1738 = vpow2.f32 %v831_v52 }
 0x2f7   :  { %v2129_v37 = vpop.eup %1732 }
 0x2f8   :  { %v591_v39 = vsel %vm453_vm7, %v2129_v37, 0.0  ;;  %v833_v56 = vmul.f32 1.442695, %v830_v54 }
 0x2f9   :  { %592 = vadd.xlane.f32.xlu0 %v591_v39 }
 0x2fa   :  { %1740 = vpow2.f32 %v833_v56 }
 0x2fb   :  { %v2144_v58 = vpop.eup %1734 }
 0x2fc   :  { %v712_v1 = vsel %vm453_vm7, %v2144_v58, 0.0 }
 0x2fd   :  { %v993_v55 = vpop.xlane.xlu0 %992 }
 0x2ff   :  { %v2146_v62 = vpop.eup %1736 }
 0x300   :  { %v715_v8 = vsel %vm453_vm7, %v2146_v62, 0.0 }
 0x305   :  { %v1115_v17 = vpop.xlane.xlu0 %1114 }
 0x306   :  { %846 = vrot.lane.b32.xlu1 %v2002_v25, %s1899_s6  ;;  %v1117_v30 = vsub.f32 %v2083_v53, %v1115_v17 }
 0x308   :  { %v1120_v9 = vmul.f32 1.442695, %v1117_v30 }
 0x30d   :  { %v1239_v22 = vpop.xlane.xlu0 %1238 }
 0x30e   :  { %v1241_v10 = vsub.f32 %v2089_v60, %v1239_v22 }
 0x30f   :  { %723 = vrot.lane.b32.xlu0 %v2002_v25, %s1897_s23  ;;  %v995_v25 = vsub.f32 %v2079_v38, %v993_v55  ;;  %v2151_v38 = vpop.eup %1738 }
 0x310   :  { %v835_v53 = vsel %vm453_vm7, %v2151_v38, 0.0  ;;  %v2159_v13 = vpop.eup %1740  ;;  %v1244_v15 = vmul.f32 1.442695, %v1241_v10 }
 0x311   :  { %v998_v12 = vmul.f32 1.442695, %v995_v25  ;;  %v471_v5 = vpop.xlane.xlu0 %470 }
 0x313   :  { %1742 = vpow2.f32 %v998_v12 }
 0x315   :  { %v1362_v51 = vpop.xlane.xlu0 %1361 }
 0x316   :  { %v1364_v19 = vsub.f32 %v2097_v6, %v1362_v51 }
 0x318   :  { %v1367_v27 = vmul.f32 1.442695, %v1364_v19 }
 0x326   :  { %v990_v59 = vpop.xlane.xlu1 %989 }
 0x327   :  { %v994_v61 = vsub.f32 %v986_v16, %v990_v59  ;;  %v838_v16 = vsel %vm453_vm7, %v2159_v13, 0.0 }
 0x329   :  { %v996_v63 = vmul.f32 1.442695, %v994_v61 }
 0x32a   :  { %v1112_v3 = vpop.xlane.xlu1 %1111  ;;  %713 = vadd.xlane.f32.xlu1 %v712_v1 }
 0x32b   :  { %1744 = vpow2.f32 %v996_v63  ;;  %v1116_v4 = vsub.f32 %v2106_v18, %v1112_v3  ;;  %v2163_v18 = vpop.eup %1742 }
 0x32c   :  { %v1003_v45 = vsel %vm453_vm7, %v2163_v18, 0.0 }
 0x32d   :  { %v1118_v11 = vmul.f32 1.442695, %v1116_v4 }
 0x32e   :  { %v1236_v14 = vpop.xlane.xlu1 %1235  ;;  %836 = vadd.xlane.f32.xlu1 %v835_v53  ;;  %716 = vadd.xlane.f32.xlu0 %v715_v8 }
 0x32f   :  { %1746 = vpow2.f32 %v1118_v11  ;;  %v1240_v43 = vsub.f32 %v2109_v20, %v1236_v14 }
 0x330   :  { %1748 = vpow2.f32 %v1120_v9 }
 0x331   :  { %1750 = vrcp.f32 %v471_v5  ;;  %v1242_v44 = vmul.f32 1.442695, %v1240_v43 }
 0x332   :  { %v468_v60 = vpop.xlane.xlu1 %467  ;;  %839 = vadd.xlane.f32.xlu0 %v838_v16 }
 0x333   :  { %1752 = vrcp.f32 %v468_v60 }
 0x334   :  { %1754 = vpow2.f32 %v1244_v15 }
 0x336   :  { %v1359_v50 = vpop.xlane.xlu1 %1358  ;;  %1004 = vadd.xlane.f32.xlu0 %v1003_v45 }
 0x337   :  { %v1363_v48 = vsub.f32 %v2117_v24, %v1359_v50 }
 0x338   :  { %v2169_v26 = vpop.eup %1744 }
 0x339   :  { %v1365_v28 = vmul.f32 1.442695, %v1363_v48  ;;  %v1000_v29 = vsel %vm453_vm7, %v2169_v26, 0.0 }
 0x33a   :  { %1001 = vadd.xlane.f32.xlu1 %v1000_v29 }
 0x33b   :  { %1756 = vpow2.f32 %v1365_v28 }
 0x33c   :  { %v2173_v31 = vpop.eup %1746  ;;  %1758 = vpow2.f32 %v1367_v27 }
 0x33d   :  { %v1122_v6 = vsel %vm453_vm7, %v2173_v31, 0.0  ;;  %v2177_v32 = vpop.eup %1748  ;;  %1760 = vpow2.f32 %v1242_v44 }
 0x33e   :  { %1123 = vadd.xlane.f32.xlu0 %v1122_v6  ;;  %v1751_v33 = vpop.eup %1750  ;;  %v1125_v34 = vsel %vm453_vm7, %v2177_v32, 0.0 }
 0x33f   :  { %v475_v39 = vmul.f32 %v1751_v33, %v2093_v0 }
 0x340   :  { %v1753_v24 = vpop.eup %1752 }
 0x341   :  { %v2181_v36 = vpop.eup %1754  ;;  %v474_v2 = vmul.f32 %v1753_v24, %v2115_v21 }
 0x342   :  { %1126 = vadd.xlane.f32.xlu0 %v1125_v34  ;;  %v1249_v40 = vsel %vm453_vm7, %v2181_v36, 0.0 }
 0x343   :  { %v476_v7 = vpack.c.bf16 %v475_v39, %v474_v2 }
 0x345   :  { %1591 = vmatmul.mubr.msk.bf16.vlgmr.msra.gmra.mxu0 %vm453_vm7, %v476_v7 }
 0x346   :  { %1250 = vadd.xlane.f32.xlu0 %v1249_v40  ;;  %1601 = vmatpush3.bf16.msra.mxu0 %v2142_v57 }
 0x347   :  { %1602 = vmatprep.mubr.msk.bf16.mxu0 %vm1896_vm0, %v1895_v49  ;;  %1612 = vmatprep.subr.bf16.mxu0 %v1895_v49 }
 0x348   :  { %v2191_v41 = vpop.eup %1756 }
 0x349   :  { %v1369_v0 = vsel %vm453_vm7, %v2191_v41, 0.0  ;;  %v2196_v21 = vpop.eup %1758 }
 0x34a   :  { %1370 = vadd.xlane.f32.xlu0 %v1369_v0  ;;  %v1372_v42 = vsel %vm453_vm7, %v2196_v21, 0.0  ;;  %v2205_v46 = vpop.eup %1760 }
 0x34b   :  { %1134 = vrot.lane.b32.xlu1 %v2000_v23, %s1898_s24  ;;  %v1246_v47 = vsel %vm453_vm7, %v2205_v46, 0.0 }
 0x34e   :  { %1373 = vadd.xlane.f32.xlu0 %v1372_v42 }
 0x364   :  { %1257 = vrot.lane.b32.xlu0 %v2000_v23, %s1897_s23 }
 0x36f   :  { %1247 = vadd.xlane.f32.xlu1 %v1246_v47 }
 0x37e   :  { %v590_v52 = vpop.xlane.xlu1 %589 }
 0x37f   :  { %1762 = vrcp.f32 %v590_v52 }
 0x380   :  { %1380 = vrot.lane.b32.xlu1 %v2000_v23, %s1899_s6 }
 0x382   :  { %v593_v54 = vpop.xlane.xlu0 %592  ;;  %v847_v17 = vpop.permute.xlu1 %846 }
 0x383   :  { %1764 = vrcp.f32 %v593_v54 }
 0x386   :  { %v724_v57 = vpop.permute.xlu0 %723 }
 0x38c   :  { %v1763_v55 = vpop.eup %1762 }
 0x38d   :  { %v596_v56 = vmul.f32 %v1763_v55, %v2125_v35 }
 0x390   :  { %v1765_v20 = vpop.eup %1764 }
 0x391   :  { %v597_v25 = vmul.f32 %v1765_v20, %v2129_v37 }
 0x393   :  { %v598_v12 = vpack.c.bf16 %v597_v25, %v596_v56 }
 0x395   :  { %1603 = vmatmul.mubr.msk.bf16.vlgmr.msra.gmra.mxu0 %vm453_vm7, %v598_v12 }
 0x396   :  { %1613 = vmatpush3.bf16.msra.mxu0 %v724_v57  ;;  %1614 = vmatprep.mubr.msk.bf16.mxu0 %vm1896_vm0, %v1895_v49 }
 0x397   :  { %1624 = vmatprep.subr.bf16.mxu0 %v1895_v49 }
 0x3b3   :  { %v714_v22 = vpop.xlane.xlu1 %713 }
 0x3b4   :  { %1766 = vrcp.f32 %v714_v22 }
 0x3b7   :  { %v717_v59 = vpop.xlane.xlu0 %716  ;;  %v837_v30 = vpop.xlane.xlu1 %836 }
 0x3b8   :  { %1768 = vrcp.f32 %v717_v59 }
 0x3bb   :  { %v840_v61 = vpop.xlane.xlu0 %839 }
 0x3bc   :  { %1770 = vrcp.f32 %v840_v61 }
 0x3bd   :  { %1772 = vrcp.f32 %v837_v30 }
 0x3bf   :  { %v1005_v35 = vpop.xlane.xlu0 %1004 }
 0x3c1   :  { %v1767_v63 = vpop.eup %1766 }
 0x3c2   :  { %v720_v4 = vmul.f32 %v1767_v63, %v2144_v58 }
 0x3c3   :  { %v1002_v37 = vpop.xlane.xlu1 %1001 }
 0x3c4   :  { %1774 = vrcp.f32 %v1002_v37 }
 0x3c5   :  { %v1769_v1 = vpop.eup %1768  ;;  %1776 = vrcp.f32 %v1005_v35 }
 0x3c6   :  { %v721_v5 = vmul.f32 %v1769_v1, %v2146_v62 }
 0x3c7   :  { %v1124_v3 = vpop.xlane.xlu0 %1123  ;;  %v1135_v45 = vpop.permute.xlu1 %1134 }
 0x3c8   :  { %v722_v8 = vpack.c.bf16 %v721_v5, %v720_v4 }
 0x3c9   :  { %v1771_v9 = vpop.eup %1770 }
 0x3ca   :  { %1615 = vmatmul.mubr.msk.bf16.vlgmr.msra.gmra.mxu0 %vm453_vm7, %v722_v8  ;;  %v1773_v11 = vpop.eup %1772  ;;  %v844_v53 = vmul.f32 %v1771_v9, %v2159_v13 }
 0x3cb   :  { %v1127_v10 = vpop.xlane.xlu0 %1126  ;;  %1625 = vmatpush3.bf16.msra.mxu0 %v847_v17  ;;  %1626 = vmatprep.mubr.msk.bf16.mxu0 %vm1896_vm0, %v1895_v49  ;;  %v843_v58 = vmul.f32 %v1773_v11, %v2151_v38 }
 0x3cc   :  { %1778 = vrcp.f32 %v1127_v10  ;;  %1636 = vmatprep.subr.bf16.mxu0 %v1895_v49 }
 0x3cd   :  { %1780 = vrcp.f32 %v1124_v3  ;;  %v845_v62 = vpack.c.bf16 %v844_v53, %v843_v58 }
 0x3cf   :  { %v1251_v14 = vpop.xlane.xlu0 %1250 }
 0x3d0   :  { %1782 = vrcp.f32 %v1251_v14 }
 0x3d1   :  { %v1775_v15 = vpop.eup %1774 }
 0x3d2   :  { %1627 = vmatmul.mubr.msk.bf16.vlgmr.msra.gmra.mxu0 %vm453_vm7, %v845_v62  ;;  %v1777_v16 = vpop.eup %1776  ;;  %v1008_v51 = vmul.f32 %v1775_v15, %v2169_v26 }
 0x3d3   :  { %1637 = vmatpush3.bf16.msra.mxu0 %v2000_v23  ;;  %1638 = vmatprep.mubr.msk.bf16.mxu0 %vm1896_vm0, %v1895_v49  ;;  %v1371_v60 = vpop.xlane.xlu0 %1370  ;;  %v1009_v13 = vmul.f32 %v1777_v16, %v2163_v18 }
 0x3d4   :  { %1648 = vmatprep.subr.bf16.mxu0 %v1895_v49 }
 0x3d5   :  { %v1010_v19 = vpack.c.bf16 %v1009_v13, %v1008_v51 }
 0x3d7   :  { %v1374_v23 = vpop.xlane.xlu0 %1373 }
 0x3d9   :  { %v1779_v38 = vpop.eup %1778 }
 0x3da   :  { %1639 = vmatmul.mubr.msk.bf16.vlgmr.msra.gmra.mxu0 %vm453_vm7, %v1010_v19  ;;  %v1781_v50 = vpop.eup %1780  ;;  %v1131_v48 = vmul.f32 %v1779_v38, %v2177_v32 }
 0x3db   :  { %1649 = vmatpush3.bf16.msra.mxu0 %v1135_v45  ;;  %1650 = vmatprep.mubr.msk.bf16.mxu0 %vm1896_vm0, %v1895_v49  ;;  %v1130_v26 = vmul.f32 %v1781_v50, %v2173_v31  ;;  %v1258_v28 = vpop.permute.xlu0 %1257 }
 0x3dc   :  { %1660 = vmatprep.subr.bf16.mxu0 %v1895_v49 }
 0x3dd   :  { %v1132_v27 = vpack.c.bf16 %v1131_v48, %v1130_v26  ;;  %v1783_v29 = vpop.eup %1782 }
 0x3de   :  { %v1255_v33 = vmul.f32 %v1783_v29, %v2181_v36 }
 0x3e2   :  { %1651 = vmatmul.mubr.msk.bf16.vlgmr.msra.gmra.mxu0 %vm453_vm7, %v1132_v27 }
 0x3e3   :  { %1661 = vmatpush3.bf16.msra.mxu0 %v1258_v28  ;;  %1662 = vmatprep.mubr.msk.bf16.mxu0 %vm1896_vm0, %v1895_v49 }
 0x3e4   :  { %1672 = vmatprep.subr.bf16.mxu0 %v1895_v49 }
 0x3f8   :  { %v1248_v18 = vpop.xlane.xlu1 %1247 }
 0x3f9   :  { %1784 = vrcp.f32 %v1248_v18 }
 0x3fa   :  { %1786 = vrcp.f32 %v1374_v23 }
 0x3fb   :  { %1788 = vrcp.f32 %v1371_v60 }
 0x3fc   :  { %v1381_v7 = vpop.permute.xlu1 %1380 }
 0x405   :  { %v2242_v32 = vpop.f32.mrf.mxu0 }
 0x406   :  { %v1785_v6 = vpop.eup %1784 }
 0x407   :  { %v1254_v31 = vmul.f32 %v1785_v6, %v2205_v46  ;;  %v1592_v24 = vpop.f32.mrf.mxu0  ;;  %v1787_v39 = vpop.eup %1786 }
 0x408   :  { %v1789_v40 = vpop.eup %1788  ;;  %v1378_v42 = vmul.f32 %v1787_v39, %v2196_v21 }
 0x409   :  { %v1256_v34 = vpack.c.bf16 %v1255_v33, %v1254_v31  ;;  %v2246_v2 = vpop.f32.mrf.mxu0  ;;  %v1377_v43 = vmul.f32 %v1789_v40, %v2191_v41 }
 0x40b   :  { %1663 = vmatmul.mubr.msk.bf16.vlgmr.msra.gmra.mxu0 %vm453_vm7, %v1256_v34  ;;  %v1593_v0 = vpop.f32.mrf.mxu0  ;;  %v1379_v44 = vpack.c.bf16 %v1378_v42, %v1377_v43 }
 0x40c   :  { %1673 = vmatpush3.bf16.msra.mxu0 %v1381_v7  ;;  %1674 = vmatprep.mubr.msk.bf16.mxu0 %vm1896_vm0, %v1895_v49 }
 0x413   :  { %1675 = vmatmul.mubr.msk.bf16.vlgmr.msra.gmra.mxu0 %vm453_vm7, %v1379_v44 }
 0x455   :  { %v640_v36 = vpop.f32.mrf.mxu0 }
 0x456   :  { %895 = vrot.lane.b32.xlu1 %v640_v36, %s1899_s6 }
 0x457   :  { %v1604_v46 = vpop.f32.mrf.mxu0 }
 0x459   :  { %v643_v47 = vpop.f32.mrf.mxu0 }
 0x45a   :  { %897 = vrot.lane.b32.xlu1 %v643_v47, %s1899_s6 }
 0x45b   :  { %v1605_v52 = vpop.f32.mrf.mxu0 }
 0x48a   :  { %v763_v54 = vpop.f32.mrf.mxu0 }
 0x48b   :  { %903 = vrot.lane.b32.xlu1 %v763_v54, %s1897_s23 }
 0x48c   :  { %v1616_v55 = vpop.f32.mrf.mxu0 }
 0x48e   :  { %v766_v49 = vpop.f32.mrf.mxu0 }
 0x48f   :  { %905 = vrot.lane.b32.xlu1 %v766_v49, %s1897_s23 }
 0x490   :  { %v1617_v21 = vpop.f32.mrf.mxu0 }
 0x492   :  { %v886_v41 = vpop.f32.mrf.mxu0 }
 0x493   :  { %911 = vrot.lane.b32.xlu0 %v886_v41, %s1898_s24 }
 0x494   :  { %v1628_v20 = vpop.f32.mrf.mxu0 }
 0x496   :  { %v889_v56 = vpop.f32.mrf.mxu0 }
 0x497   :  { %913 = vrot.lane.b32.xlu1 %v889_v56, %s1898_s24 }
 0x498   :  { %v1629_v25 = vpop.f32.mrf.mxu0 }
 0x49a   :  { %v1048_v12 = vpop.f32.mrf.mxu0 }
 0x49c   :  { %v1640_v57 = vpop.f32.mrf.mxu0 }
 0x49e   :  { %v1051_v17 = vpop.f32.mrf.mxu0 }
 0x4a0   :  { %v1641_v22 = vpop.f32.mrf.mxu0 }
 0x4a2   :  { %v1174_v59 = vpop.f32.mrf.mxu0 }
 0x4a3   :  { %1429 = vrot.lane.b32.xlu0 %v1174_v59, %s1899_s6 }
 0x4a4   :  { %v1652_v61 = vpop.f32.mrf.mxu0 }
 0x4a6   :  { %v1177_v30 = vpop.f32.mrf.mxu0 }
 0x4a7   :  { %1431 = vrot.lane.b32.xlu1 %v1177_v30, %s1899_s6 }
 0x4a8   :  { %v1653_v35 = vpop.f32.mrf.mxu0 }
 0x4c8   :  { %v896_v10 = vpop.permute.xlu1 %895 }
 0x4c9   :  { %v917_v58 = vsel %vm403_vm1, %v2242_v32, %v896_v10 }
 0x4cb   :  { %v1297_v37 = vpop.f32.mrf.mxu0 }
 0x4cc   :  { %1437 = vrot.lane.b32.xlu0 %v1297_v37, %s1897_s23  ;;  %v898_v11 = vpop.permute.xlu1 %897 }
 0x4cd   :  { %v1664_v63 = vpop.f32.mrf.mxu0  ;;  %v918_v51 = vsel %vm403_vm1, %v2246_v2, %v898_v11 }
 0x4cf   :  { %v1300_v1 = vpop.f32.mrf.mxu0 }
 0x4d0   :  { %1439 = vrot.lane.b32.xlu1 %v1300_v1, %s1897_s23 }
 0x4d1   :  { %v1665_v3 = vpop.f32.mrf.mxu0 }
 0x4d3   :  { %v1420_v4 = vpop.f32.mrf.mxu0 }
 0x4d4   :  { %1445 = vrot.lane.b32.xlu0 %v1420_v4, %s1898_s24 }
 0x4d5   :  { %v1676_v5 = vpop.f32.mrf.mxu0 }
 0x4d7   :  { %v1423_v8 = vpop.f32.mrf.mxu0 }
 0x4d8   :  { %1447 = vrot.lane.b32.xlu1 %v1423_v8, %s1898_s24 }
 0x4d9   :  { %v1677_v9 = vpop.f32.mrf.mxu0 }
 0x4fd   :  { %v904_v53 = vpop.permute.xlu1 %903 }
 0x4fe   :  { %v920_v14 = vsel %vm919_vm13, %v917_v58, %v904_v53 }
 0x501   :  { %v906_v62 = vpop.permute.xlu1 %905 }
 0x502   :  { %v921_v60 = vsel %vm919_vm13, %v918_v51, %v906_v62 }
 0x505   :  { %v912_v15 = vpop.permute.xlu0 %911 }
 0x506   :  { %v923_v16 = vsel %vm922_vm14, %v920_v14, %v912_v15 }
 0x507   :  { %925 = vst [vmem:[#allocation10] sm:$0xff] %v923_v16 }
 0x509   :  { %v914_v13 = vpop.permute.xlu1 %913 }
 0x50a   :  { %v924_v19 = vsel %vm922_vm14, %v921_v60, %v914_v13 }
 0x50b   :  { %926 = vst [vmem:[#allocation10 + $0x8] sm:$0xff] %v924_v19 }
 0x515   :  { %v1430_v38 = vpop.permute.xlu0 %1429 }
 0x516   :  { %v1451_v23 = vsel %vm403_vm1, %v1048_v12, %v1430_v38 }
 0x519   :  { %v1432_v45 = vpop.permute.xlu1 %1431 }
 0x51a   :  { %v1452_v18 = vsel %vm403_vm1, %v1051_v17, %v1432_v45 }
 0x53e   :  { %v1438_v50 = vpop.permute.xlu0 %1437 }
 0x53f   :  { %v1453_v48 = vsel %vm919_vm13, %v1451_v23, %v1438_v50 }
 0x542   :  { %v1440_v26 = vpop.permute.xlu1 %1439 }
 0x543   :  { %v1454_v29 = vsel %vm919_vm13, %v1452_v18, %v1440_v26 }
 0x546   :  { %v1446_v27 = vpop.permute.xlu0 %1445 }
 0x547   :  { %v1455_v28 = vsel %vm922_vm14, %v1453_v48, %v1446_v27 }
 0x548   :  { %1457 = vst [vmem:[#allocation10 + $0x10] sm:$0xff] %v1455_v28 }
 0x54a   :  { %v1448_v6 = vpop.permute.xlu1 %1447 }
 0x54b   :  { %v1456_v32 = vsel %vm922_vm14, %v1454_v29, %v1448_v6 }
 0x54c   :  { %1458 = vst [vmem:[#allocation10 + $0x18] sm:$0xff] %v1456_v32 }
 0x54d   :  { %1869 = shalt.err (!%p1866_p5)
}
 0x54e   :  { %1470 = dma.vmem_to_hbm [thread:$0]  %s1465_s28, 512, %s2293_s7, [#allocation6], %s1889_s0, %s1889_s0, %s1890_s9  }
 0x54f   :  { %1884 = dma.done.wait [#allocation6], 512  }
 0x550   :  { %1885 = vsyncadd [#allocation6], 4294966784 }
 0x551   :  { %1474 = vsyncpa [#allocation5], 1 }
 0x552   :  { %1475 = vsyncpa [#allocation8], 1 }
 0x553   :  { %1476 = vsyncpa [#allocation6], 1 }

</bundles_post_ra>
